<compile_context>
chip_gen: v5e
topology: v5e:2x2
jax: 0.10.0
libtpu: 0.0.40
codegen_flags: <defaults>
</compile_context>

<pallas_src>
import functools

import jax
import jax.numpy as jnp
from jax.experimental import pallas as pl
from jax.experimental.pallas import tpu as pltpu


def _agg_kernel(user_ref, relp_ref, ta_ref, out_ref, *, R, D):
    # user_ref : (bn, D)        float32
    # relp_ref : (D, RP)        float32   (rel zero-padded to RP>=128 lanes)
    # ta_ref   : (bn, R*D)      float32   (to_agg flattened over (R, D))
    # out_ref  : (bn, D)        float32
    user = user_ref[...]
    relp = relp_ref[...]

    # scores = user @ rel_padded  -> (bn, RP)   (single MXU push, lane-dense)
    scores = jnp.dot(user, relp, preferred_element_type=jnp.float32)

    # LeakyReLU(negative_slope=0.1)  (matches `leaky = LeakyReLU(0.1)`)
    scores = jnp.where(scores > 0, scores, 0.1 * scores)

    # Mask the zero-padded relation columns so softmax ignores them.
    col = jax.lax.broadcasted_iota(jnp.int32, scores.shape, 1)
    scores = jnp.where(col < R, scores, jnp.float32(-1e30))

    # Numerically stable softmax over the relation axis (torch dim=1).
    scores = scores - jnp.max(scores, axis=-1, keepdims=True)
    e = jnp.exp(scores)
    probs = e * pl.reciprocal(jnp.sum(e, axis=-1, keepdims=True), approx=False)

    # context[n, d] = sum_r probs[n, r] * to_agg[n, r, d]
    # Unrolled VPU multiply-add over the R chunks of the flattened to_agg.
    ta = ta_ref[...]
    ctx = probs[:, 0:1] * ta[:, 0:D]
    for r in range(1, R):
        ctx = ctx + probs[:, r:r + 1] * ta[:, r * D:(r + 1) * D]

    out_ref[...] = ctx.astype(out_ref.dtype)


def aggregator_forward(user, to_agg, rel, *, num_blocks=1):
    """Pallas implementation of aggregator.forward(user, to_agg, rel).

    num_blocks=1 is optimal on v5e/v6e (single TensorCore).  On v7x, pass
    num_blocks=2 to shard the parallel grid axis across both TensorCores.
    """
    N, D = user.shape
    Dr, R = rel.shape
    assert Dr == D, (Dr, D)
    assert to_agg.shape == (N, R, D), to_agg.shape
    assert N % num_blocks == 0
    block_n = N // num_blocks
    assert block_n % 8 == 0, "block_n must be sublane (8) aligned"

    # Pad rel to a lane-dense width once (it is fetched a single time).
    RP = max(128, pl.cdiv(R, 128) * 128)
    rel_p = jnp.zeros((D, RP), dtype=rel.dtype).at[:, :R].set(rel)

    # Contiguous (free) flatten: (N, R, D) -> (N, R*D) so the dominant input
    # DMA is dense instead of a (R, D) -> (8, 128) padded trailing tile.
    ta_flat = to_agg.reshape(N, R * D)

    out2d = pl.pallas_call(
        functools.partial(_agg_kernel, R=R, D=D),
        out_shape=jax.ShapeDtypeStruct((N, D), user.dtype),
        grid=(num_blocks,),
        in_specs=[
            pl.BlockSpec((block_n, D), lambda i: (i, 0)),      # user
            pl.BlockSpec((D, RP), lambda i: (0, 0)),           # rel (padded)
            pl.BlockSpec((block_n, R * D), lambda i: (i, 0)),  # to_agg (flat)
        ],
        out_specs=pl.BlockSpec((block_n, D), lambda i: (i, 0)),
        compiler_params=pltpu.CompilerParams(
            dimension_semantics=("parallel",),
        ),
    )(user, rel_p, ta_flat)

    # Restore the (N, 1, D) shape of torch.bmm(scores.unsqueeze(1), to_agg).
    return out2d[:, None, :]


def _reference(user, to_agg, rel):
    scores = user @ rel
    scores = jnp.where(scores > 0, scores, 0.1 * scores)
    scores = jax.nn.softmax(scores, axis=1)
    return jnp.einsum("nr,nrd->nd", scores, to_agg)[:, None, :]


if __name__ == "__main__":
    # Shapes from the module docstring: user 128x64, rel 64x5, to_agg 128x5x64
    N, D, R = 128, 64, 5

    key = jax.random.PRNGKey(0)
    k1, k2, k3 = jax.random.split(key, 3)
    user = jax.random.normal(k1, (N, D), dtype=jnp.float32)
    rel = jax.random.normal(k2, (D, R), dtype=jnp.float32)
    to_agg = jax.random.normal(k3, (N, R, D), dtype=jnp.float32)

    out = aggregator_forward(user, to_agg, rel)
    out = jax.block_until_ready(out)

    ref = _reference(user, to_agg, rel)
    assert out.shape == (N, 1, D), out.shape
    assert jnp.allclose(out, ref, atol=1e-5, rtol=1e-5), (
        float(jnp.max(jnp.abs(out - ref)))
    )

    print("KERNEL_OK")
</pallas_src>

<mosaic_0001>
module attributes {stable_mosaic.version = 11 : i64} {
  func.func @_agg_kernel(%arg0: i32, %arg1: memref<128x64xf32, #tpu.memory_space<vmem>>, %arg2: memref<64x128xf32, #tpu.memory_space<vmem>>, %arg3: memref<128x320xf32, #tpu.memory_space<vmem>>, %arg4: memref<128x64xf32, #tpu.memory_space<vmem>>) attributes {dimension_semantics = [#tpu.dimension_semantics<parallel>], iteration_bounds = array<i64: 1>, scalar_prefetch = 0 : i64, scratch_operands = 0 : i64, tpu.core_type = #tpu.core_type<tc>, window_params = [{transform_indices = @transform_0, window_bounds = array<i64: 128, 64>}, {pipeline_mode = #tpu.pipeline_mode<synchronous>, transform_indices = @transform_1, window_bounds = array<i64: 64, 128>}, {transform_indices = @transform_2, window_bounds = array<i64: 128, 320>}, {transform_indices = @transform_3, window_bounds = array<i64: 128, 64>}]} {
    %c0 = arith.constant 0 : index
    %c0_0 = arith.constant 0 : index
    %0 = vector.load %arg1[%c0, %c0_0] : memref<128x64xf32, #tpu.memory_space<vmem>>, vector<128x64xf32>
    %c0_1 = arith.constant 0 : index
    %c0_2 = arith.constant 0 : index
    %1 = vector.load %arg2[%c0_1, %c0_2] : memref<64x128xf32, #tpu.memory_space<vmem>>, vector<64x128xf32>
    %cst = arith.constant dense<0.000000e+00> : vector<128x128xf32>
    %2 = tpu.matmul %0, %1, %cst {dimension_numbers = #tpu.dot_dimension_numbers<[1], [0], [0], [1], [0, 0, 1, 1], [], []>} : vector<128x64xf32>, vector<64x128xf32>, vector<128x128xf32> -> vector<128x128xf32>
    %cst_3 = arith.constant 0.000000e+00 : f32
    %3 = vector.broadcast %cst_3 : f32 to vector<128x128xf32>
    %4 = arith.cmpf ogt, %2, %3 : vector<128x128xf32>
    %cst_4 = arith.constant 1.000000e-01 : f32
    %5 = vector.broadcast %cst_4 : f32 to vector<128x128xf32>
    %6 = arith.mulf %5, %2 : vector<128x128xf32>
    %7 = arith.select %4, %2, %6 : vector<128x128xi1>, vector<128x128xf32>
    %8 = tpu.iota {dimensions = array<i32: 1>} : vector<128x128xi32>
    %c5_i32 = arith.constant 5 : i32
    %9 = vector.broadcast %c5_i32 : i32 to vector<128x128xi32>
    %10 = arith.cmpi slt, %8, %9 : vector<128x128xi32>
    %cst_5 = arith.constant -1.000000e+30 : f32
    %11 = vector.broadcast %cst_5 : f32 to vector<128x128xf32>
    %12 = arith.select %10, %7, %11 : vector<128x128xi1>, vector<128x128xf32>
    %cst_6 = arith.constant dense<0xFF800000> : vector<128xf32>
    %13 = vector.multi_reduction <maximumf>, %12, %cst_6 [1] : vector<128x128xf32> to vector<128xf32>
    %14 = vector.shape_cast %13 : vector<128xf32> to vector<128x1xf32>
    %15 = vector.broadcast %14 : vector<128x1xf32> to vector<128x128xf32>
    %16 = arith.subf %12, %15 : vector<128x128xf32>
    %17 = math.exp %16 : vector<128x128xf32>
    %cst_7 = arith.constant dense<0.000000e+00> : vector<128xf32>
    %18 = vector.multi_reduction <add>, %17, %cst_7 [1] : vector<128x128xf32> to vector<128xf32>
    %19 = vector.shape_cast %18 : vector<128xf32> to vector<128x1xf32>
    %20 = tpu.reciprocal %19 : vector<128x1xf32> -> vector<128x1xf32>
    %21 = vector.broadcast %20 : vector<128x1xf32> to vector<128x128xf32>
    %22 = arith.mulf %17, %21 : vector<128x128xf32>
    %c0_8 = arith.constant 0 : index
    %c0_9 = arith.constant 0 : index
    %23 = vector.load %arg3[%c0_8, %c0_9] : memref<128x320xf32, #tpu.memory_space<vmem>>, vector<128x320xf32>
    %24 = vector.extract_strided_slice %22 {offsets = [0, 0], sizes = [128, 1], strides = [1, 1]} : vector<128x128xf32> to vector<128x1xf32>
    %25 = vector.extract_strided_slice %23 {offsets = [0, 0], sizes = [128, 64], strides = [1, 1]} : vector<128x320xf32> to vector<128x64xf32>
    %26 = vector.broadcast %24 : vector<128x1xf32> to vector<128x64xf32>
    %27 = arith.mulf %26, %25 : vector<128x64xf32>
    %28 = vector.extract_strided_slice %22 {offsets = [0, 1], sizes = [128, 1], strides = [1, 1]} : vector<128x128xf32> to vector<128x1xf32>
    %29 = vector.extract_strided_slice %23 {offsets = [0, 64], sizes = [128, 64], strides = [1, 1]} : vector<128x320xf32> to vector<128x64xf32>
    %30 = vector.broadcast %28 : vector<128x1xf32> to vector<128x64xf32>
    %31 = arith.mulf %30, %29 : vector<128x64xf32>
    %32 = arith.addf %27, %31 : vector<128x64xf32>
    %33 = vector.extract_strided_slice %22 {offsets = [0, 2], sizes = [128, 1], strides = [1, 1]} : vector<128x128xf32> to vector<128x1xf32>
    %34 = vector.extract_strided_slice %23 {offsets = [0, 128], sizes = [128, 64], strides = [1, 1]} : vector<128x320xf32> to vector<128x64xf32>
    %35 = vector.broadcast %33 : vector<128x1xf32> to vector<128x64xf32>
    %36 = arith.mulf %35, %34 : vector<128x64xf32>
    %37 = arith.addf %32, %36 : vector<128x64xf32>
    %38 = vector.extract_strided_slice %22 {offsets = [0, 3], sizes = [128, 1], strides = [1, 1]} : vector<128x128xf32> to vector<128x1xf32>
    %39 = vector.extract_strided_slice %23 {offsets = [0, 192], sizes = [128, 64], strides = [1, 1]} : vector<128x320xf32> to vector<128x64xf32>
    %40 = vector.broadcast %38 : vector<128x1xf32> to vector<128x64xf32>
    %41 = arith.mulf %40, %39 : vector<128x64xf32>
    %42 = arith.addf %37, %41 : vector<128x64xf32>
    %43 = vector.extract_strided_slice %22 {offsets = [0, 4], sizes = [128, 1], strides = [1, 1]} : vector<128x128xf32> to vector<128x1xf32>
    %44 = vector.extract_strided_slice %23 {offsets = [0, 256], sizes = [128, 64], strides = [1, 1]} : vector<128x320xf32> to vector<128x64xf32>
    %45 = vector.broadcast %43 : vector<128x1xf32> to vector<128x64xf32>
    %46 = arith.mulf %45, %44 : vector<128x64xf32>
    %47 = arith.addf %42, %46 : vector<128x64xf32>
    %c0_10 = arith.constant 0 : index
    %c0_11 = arith.constant 0 : index
    %48 = vector.load %arg4[%c0_10, %c0_11] : memref<128x64xf32, #tpu.memory_space<vmem>>, vector<128x64xf32>
    tpu.vector_store %arg4[%c0_10, %c0_11], %47 {strides = array<i32>} : memref<128x64xf32, #tpu.memory_space<vmem>>, vector<128x64xf32>,
    return
  }
  func.func @transform_0(%arg0: i32) -> (i32, i32) {
    %c0_i32 = arith.constant 0 : i32
    %c0_i32_0 = arith.constant 0 : i32
    return %arg0, %c0_i32 : i32, i32
  }
  func.func @transform_1(%arg0: i32) -> (i32, i32) {
    %c0_i32 = arith.constant 0 : i32
    %c0_i32_0 = arith.constant 0 : i32
    %c0_i32_1 = arith.constant 0 : i32
    return %c0_i32, %c0_i32_0 : i32, i32
  }
  func.func @transform_2(%arg0: i32) -> (i32, i32) {
    %c0_i32 = arith.constant 0 : i32
    %c0_i32_0 = arith.constant 0 : i32
    return %arg0, %c0_i32 : i32, i32
  }
  func.func @transform_3(%arg0: i32) -> (i32, i32) {
    %c0_i32 = arith.constant 0 : i32
    %c0_i32_0 = arith.constant 0 : i32
    return %arg0, %c0_i32 : i32, i32
  }
}

</mosaic_0001>

<bundles_post_ra>
// kernel: tpu_custom_call.1
= control target key start
LH: loop header
LB: loop body
LE: loop exit
PB: predicated region body
PF: predicated region fallthrough
CT: control target
= control target key end

     0   :  { %vm38_vm0 = vcmask 523264   ;;  %v200_v24 = vlaneseq  ;;  %s1440_s29 = smov 64   ;;  %s2489_s1 = inlined_call_operand.vmem [shape: f32[64,128], index: 1, kind: input, shape index: {}]   ;;  %s2490_s0 = inlined_call_operand.vmem [shape: f32[128,64], index: 0, kind: input, shape index: {}]   ;;  %s2491_s2 = inlined_call_operand.vmem [shape: f32[128,320], index: 2, kind: input, shape index: {}]   ;;  %s2492_s3 = inlined_call_operand.vmem [shape: f32[128,64], index: 3, kind: output, shape index: {}]  }
   0x1   :  { %v37_v0 = vld [vmem:[%s2489_s1 + $0x38] sm:$0xff]  ;;  %v36_v1 = vld [vmem:[%s2489_s1 + $0x30] sm:$0xff]  ;;  %v35_v2 = vld [vmem:[%s2489_s1 + $0x28] sm:$0xff] }
   0x2   :  { %95 = vmatpush.msra.mxu0 %v37_v0  ;;  %1263 = vmatpush.msra.mxu1 %v37_v0  ;;  %v34_v3 = vld [vmem:[%s2489_s1 + $0x20] sm:$0xff]  ;;  %v33_v4 = vld [vmem:[%s2489_s1 + $0x18] sm:$0xff]  ;;  %v32_v5 = vld [vmem:[%s2489_s1 + $0x10] sm:$0xff]  ;;  %v1549_v25 = vand.u32 127, %v200_v24 }
   0x3   :  { %1265 = vmatpush.msra.mxu3 %v37_v0  ;;  %1264 = vmatpush.msra.mxu2 %v37_v0  ;;  %v31_v6 = vld [vmem:[%s2489_s1 + $0x8] sm:$0xff]  ;;  %v30_v7 = vld [vmem:[%s2489_s1] sm:$0xff]  ;;  %v16_v16 = vld [vmem:[%s2490_s0 + $0x10] sm:$0xff] }
   0x4   :  { %96 = vmatpush.msra.mxu0 %v36_v1  ;;  %1266 = vmatpush.msra.mxu1 %v36_v1  ;;  %v14_v8 = vld [vmem:[%s2490_s0] sm:$0xff]  ;;  %v15_v12 = vld [vmem:[%s2490_s0 + $0x8] sm:$0xff]  ;;  %v28_v17 = vld [vmem:[%s2490_s0 + $0x70] sm:$0xff]  ;;  %vm202_vm2 = vcmp.lt.s32.totalorder %v1549_v25, 5 }
   0x5   :  { %1268 = vmatpush.msra.mxu3 %v36_v1  ;;  %1267 = vmatpush.msra.mxu2 %v36_v1  ;;  %v18_v9 = vld [vmem:[%s2490_s0 + $0x20] sm:$0xff]  ;;  %v27_v13 = vld [vmem:[%s2490_s0 + $0x68] sm:$0xff]  ;;  %v20_v18 = vld [vmem:[%s2490_s0 + $0x30] sm:$0xff] }
   0x6   :  { %97 = vmatpush.msra.mxu0 %v35_v2  ;;  %1269 = vmatpush.msra.mxu1 %v35_v2  ;;  %v26_v10 = vld [vmem:[%s2490_s0 + $0x60] sm:$0xff]  ;;  %v19_v14 = vld [vmem:[%s2490_s0 + $0x28] sm:$0xff]  ;;  %v24_v19 = vld [vmem:[%s2490_s0 + $0x50] sm:$0xff] }
   0x7   :  { %1271 = vmatpush.msra.mxu3 %v35_v2  ;;  %1270 = vmatpush.msra.mxu2 %v35_v2  ;;  %v22_v11 = vld [vmem:[%s2490_s0 + $0x40] sm:$0xff]  ;;  %v23_v15 = vld [vmem:[%s2490_s0 + $0x48] sm:$0xff]  ;;  %v17_v20 = vld [vmem:[%s2490_s0 + $0x18] sm:$0xff] }
   0x8   :  { %98 = vmatpush.msra.mxu0 %v34_v3  ;;  %1272 = vmatpush.msra.mxu1 %v34_v3  ;;  %v29_v21 = vld [vmem:[%s2490_s0 + $0x78] sm:$0xff] }
   0x9   :  { %1274 = vmatpush.msra.mxu3 %v34_v3  ;;  %1273 = vmatpush.msra.mxu2 %v34_v3  ;;  %v21_v22 = vld [vmem:[%s2490_s0 + $0x38] sm:$0xff] }
   0xa   :  { %99 = vmatpush.msra.mxu0 %v33_v4  ;;  %1275 = vmatpush.msra.mxu1 %v33_v4  ;;  %v25_v23 = vld [vmem:[%s2490_s0 + $0x58] sm:$0xff] }
   0xb   :  { %1277 = vmatpush.msra.mxu3 %v33_v4  ;;  %1276 = vmatpush.msra.mxu2 %v33_v4 }
   0xc   :  { %100 = vmatpush.msra.mxu0 %v32_v5  ;;  %1278 = vmatpush.msra.mxu1 %v32_v5 }
   0xd   :  { %1280 = vmatpush.msra.mxu3 %v32_v5  ;;  %1279 = vmatpush.msra.mxu2 %v32_v5 }
   0xe   :  { %101 = vmatpush.msra.mxu0 %v31_v6  ;;  %1281 = vmatpush.msra.mxu1 %v31_v6 }
   0xf   :  { %1283 = vmatpush.msra.mxu3 %v31_v6  ;;  %1282 = vmatpush.msra.mxu2 %v31_v6 }
  0x10   :  { %102 = vmatpush.msra.mxu0 %v30_v7  ;;  %1284 = vmatpush.msra.mxu1 %v30_v7 }
  0x11   :  { %1286 = vmatpush.msra.mxu3 %v30_v7  ;;  %1247 = vmatmul.msk.f32.vlgmr.msra.gmra.mxu0 %vm38_vm0, %v14_v8 }
  0x12   :  { %1251 = vmatmul.msk.f32.vlgmr.msra.gmra.mxu1 %vm38_vm0, %v18_v9  ;;  %1259 = vmatmul.msk.f32.vlgmr.msra.gmra.mxu3 %vm38_vm0, %v26_v10 }
  0x13   :  { %1285 = vmatpush.msra.mxu2 %v30_v7 }
  0x14   :  { %1255 = vmatmul.msk.f32.vlgmr.msra.gmra.mxu2 %vm38_vm0, %v22_v11 }
  0x19   :  { %1248 = vmatmul.msk.f32.gmra.mxu0 %vm38_vm0, %v15_v12 }
  0x1a   :  { %1260 = vmatmul.msk.f32.gmra.mxu3 %vm38_vm0, %v27_v13  ;;  %1252 = vmatmul.msk.f32.gmra.mxu1 %vm38_vm0, %v19_v14 }
  0x1c   :  { %1256 = vmatmul.msk.f32.gmra.mxu2 %vm38_vm0, %v23_v15 }
  0x21   :  { %1249 = vmatmul.msk.f32.gmra.mxu0 %vm38_vm0, %v16_v16 }
  0x22   :  { %1261 = vmatmul.msk.f32.gmra.mxu3 %vm38_vm0, %v28_v17  ;;  %1253 = vmatmul.msk.f32.gmra.mxu1 %vm38_vm0, %v20_v18 }
  0x24   :  { %1257 = vmatmul.msk.f32.gmra.mxu2 %vm38_vm0, %v24_v19 }
  0x29   :  { %1250 = vmatmul.msk.f32.gmra.mxu0 %vm38_vm0, %v17_v20 }
  0x2a   :  { %1262 = vmatmul.msk.f32.gmra.mxu3 %vm38_vm0, %v29_v21  ;;  %1254 = vmatmul.msk.f32.gmra.mxu1 %vm38_vm0, %v21_v22 }
  0x2c   :  { %1258 = vmatmul.msk.f32.gmra.mxu2 %vm38_vm0, %v25_v23 }
  0x8e   :  { %v104_v26 = vpop.f32.mrf.mxu0 }
  0x8f   :  { %vm152_vm1 = vcmp.gt.f32.partialorder %v104_v26, 0.0  ;;  %v168_v27 = vmul.f32 0.1, %v104_v26  ;;  %v116_v28 = vpop.f32.mrf.mxu1 }
  0x90   :  { %vm156_vm3 = vcmp.gt.f32.partialorder %v116_v28, 0.0  ;;  %v172_v29 = vmul.f32 0.1, %v116_v28 }
  0x91   :  { %v184_v30 = vsel %vm152_vm1, %v104_v26, %v168_v27 }
  0x92   :  { %v188_v31 = vsel %vm156_vm3, %v116_v28, %v172_v29  ;;  %v1554_v32 = vsel %vm202_vm2, %v184_v30, -1e+30 }
  0x93   :  { %v1558_v33 = vsel %vm202_vm2, %v188_v31, -1e+30  ;;  %219 = vmax.xlane.f32.xlu0 %v1554_v32 }
  0x94   :  { %227 = vmax.xlane.f32.xlu2 %v1558_v33 }
  0x95   :  { %v140_v34 = vpop.f32.mrf.mxu3 }
  0x96   :  { %vm164_vm4 = vcmp.gt.f32.partialorder %v140_v34, 0.0  ;;  %v180_v35 = vmul.f32 0.1, %v140_v34  ;;  %v107_v36 = vpop.f32.mrf.mxu0 }
  0x97   :  { %v128_v37 = vpop.f32.mrf.mxu2  ;;  %v119_v38 = vpop.f32.mrf.mxu1  ;;  %v169_v42 = vmul.f32 0.1, %v107_v36  ;;  %vm153_vm6 = vcmp.gt.f32.partialorder %v107_v36, 0.0 }
  0x98   :  { %vm160_vm5 = vcmp.gt.f32.partialorder %v128_v37, 0.0  ;;  %v176_v39 = vmul.f32 0.1, %v128_v37  ;;  %v196_v40 = vsel %vm164_vm4, %v140_v34, %v180_v35  ;;  %v173_v43 = vmul.f32 0.1, %v119_v38 }
  0x99   :  { %v1564_v41 = vsel %vm202_vm2, %v196_v40, -1e+30  ;;  %vm157_vm7 = vcmp.gt.f32.partialorder %v119_v38, 0.0  ;;  %v185_v48 = vsel %vm153_vm6, %v107_v36, %v169_v42 }
  0x9a   :  { %v192_v44 = vsel %vm160_vm5, %v128_v37, %v176_v39  ;;  %v189_v47 = vsel %vm157_vm7, %v119_v38, %v173_v43  ;;  %v1578_v54 = vsel %vm202_vm2, %v185_v48, -1e+30 }
  0x9b   :  { %v1568_v45 = vsel %vm202_vm2, %v192_v44, -1e+30  ;;  %243 = vmax.xlane.f32.xlu0 %v1564_v41  ;;  %v1574_v53 = vsel %vm202_vm2, %v189_v47, -1e+30 }
  0x9c   :  { %235 = vmax.xlane.f32.xlu2 %v1568_v45 }
  0x9d   :  { %v143_v46 = vpop.f32.mrf.mxu3 }
  0x9e   :  { %vm165_vm8 = vcmp.gt.f32.partialorder %v143_v46, 0.0  ;;  %v181_v49 = vmul.f32 0.1, %v143_v46  ;;  %v110_v50 = vpop.f32.mrf.mxu0 }
  0x9f   :  { %v131_v51 = vpop.f32.mrf.mxu2  ;;  %v170_v55 = vmul.f32 0.1, %v110_v50  ;;  %vm154_vm9 = vcmp.gt.f32.partialorder %v110_v50, 0.0  ;;  %v122_v61 = vpop.f32.mrf.mxu1 }
  0xa0   :  { %v197_v52 = vsel %vm165_vm8, %v143_v46, %v181_v49  ;;  %v177_v56 = vmul.f32 0.1, %v131_v51  ;;  %vm161_vm10 = vcmp.gt.f32.partialorder %v131_v51, 0.0  ;;  %v174_v4 = vmul.f32 0.1, %v122_v61 }
  0xa1   :  { %v1582_v57 = vsel %vm202_vm2, %v197_v52, -1e+30  ;;  %v186_v58 = vsel %vm154_vm9, %v110_v50, %v170_v55  ;;  %vm158_vm13 = vcmp.gt.f32.partialorder %v122_v61, 0.0 }
  0xa2   :  { %245 = vmax.xlane.f32.xlu1 %v1582_v57  ;;  %v193_v60 = vsel %vm161_vm10, %v131_v51, %v177_v56  ;;  %v1589_v0 = vsel %vm202_vm2, %v186_v58, -1e+30  ;;  %v190_v7 = vsel %vm158_vm13, %v122_v61, %v174_v4 }
  0xa3   :  { %221 = vmax.xlane.f32.xlu0 %v1578_v54  ;;  %v1593_v3 = vsel %vm202_vm2, %v193_v60, -1e+30  ;;  %v1608_v12 = vsel %vm202_vm2, %v190_v7, -1e+30 }
  0xa4   :  { %229 = vmax.xlane.f32.xlu2 %v1574_v53 }
  0xa5   :  { %v146_v59 = vpop.f32.mrf.mxu3 }
  0xa6   :  { %vm166_vm11 = vcmp.gt.f32.partialorder %v146_v59, 0.0  ;;  %v182_v62 = vmul.f32 0.1, %v146_v59  ;;  %v113_v8 = vpop.f32.mrf.mxu0 }
  0xa7   :  { %v134_v63 = vpop.f32.mrf.mxu2  ;;  %v171_v14 = vmul.f32 0.1, %v113_v8  ;;  %vm155_vm15 = vcmp.gt.f32.partialorder %v113_v8, 0.0  ;;  %v125_v20 = vpop.f32.mrf.mxu1 }
  0xa8   :  { %v178_v1 = vmul.f32 0.1, %v134_v63  ;;  %v198_v2 = vsel %vm166_vm11, %v146_v59, %v182_v62  ;;  %vm162_vm12 = vcmp.gt.f32.partialorder %v134_v63, 0.0  ;;  %v175_v23 = vmul.f32 0.1, %v125_v20 }
  0xa9   :  { %v1597_v5 = vsel %vm202_vm2, %v198_v2, -1e+30  ;;  %v187_v18 = vsel %vm155_vm15, %v113_v8, %v171_v14  ;;  %vm159_vm3 = vcmp.gt.f32.partialorder %v125_v20, 0.0 }
  0xaa   :  { %223 = vmax.xlane.f32.xlu1 %v1589_v0  ;;  %v194_v6 = vsel %vm162_vm12, %v134_v63, %v178_v1  ;;  %v1619_v21 = vsel %vm202_vm2, %v187_v18, -1e+30  ;;  %v191_v24 = vsel %vm159_vm3, %v125_v20, %v175_v23 }
  0xab   :  { %237 = vmax.xlane.f32.xlu0 %v1593_v3  ;;  %v1604_v11 = vsel %vm202_vm2, %v194_v6, -1e+30  ;;  %v1629_v26 = vsel %vm202_vm2, %v191_v24, -1e+30 }
  0xac   :  { %247 = vmax.xlane.f32.xlu2 %v1597_v5 }
  0xad   :  { %v149_v9 = vpop.f32.mrf.mxu3 }
  0xae   :  { %v183_v15 = vmul.f32 0.1, %v149_v9  ;;  %vm167_vm1 = vcmp.gt.f32.partialorder %v149_v9, 0.0 }
  0xaf   :  { %v137_v10 = vpop.f32.mrf.mxu2 }
  0xb0   :  { %vm163_vm14 = vcmp.gt.f32.partialorder %v137_v10, 0.0  ;;  %v179_v13 = vmul.f32 0.1, %v137_v10  ;;  %v199_v19 = vsel %vm167_vm1, %v149_v9, %v183_v15 }
  0xb1   :  { %v1623_v22 = vsel %vm202_vm2, %v199_v19, -1e+30 }
  0xb2   :  { %239 = vmax.xlane.f32.xlu1 %v1604_v11  ;;  %v195_v16 = vsel %vm163_vm14, %v137_v10, %v179_v13 }
  0xb3   :  { %v1613_v17 = vsel %vm202_vm2, %v195_v16, -1e+30  ;;  %231 = vmax.xlane.f32.xlu0 %v1608_v12 }
  0xb4   :  { %241 = vmax.xlane.f32.xlu2 %v1613_v17 }
  0xba   :  { %225 = vmax.xlane.f32.xlu1 %v1619_v21 }
  0xbb   :  { %249 = vmax.xlane.f32.xlu0 %v1623_v22 }
  0xc2   :  { %233 = vmax.xlane.f32.xlu1 %v1629_v26 }
 0x106   :  { %v220_v27 = vpop.xlane.xlu0 %219 }
 0x107   :  { %v228_v28 = vpop.xlane.xlu2 %227  ;;  %v251_v29 = vsub.f32 %v1554_v32, %v220_v27 }
 0x108   :  { %v255_v30 = vsub.f32 %v1558_v33, %v228_v28  ;;  %v1436_v28 = vmov 0  }
 0x109   :  { %v267_v31 = vmul.f32 1.442695, %v251_v29  ;;  %1293 = vset.pattern.permute.xlu2 %v1436_v28  ;;  %1302 = vset.pattern.permute.xlu0 %v1436_v28 }
 0x10a   :  { %v275_v34 = vmul.f32 1.442695, %v255_v30 }
 0x10b   :  { %1371 = vpow2.f32 %v267_v31 }
 0x10c   :  { %1373 = vpow2.f32 %v275_v34 }
 0x10e   :  { %v244_v35 = vpop.xlane.xlu0 %243 }
 0x10f   :  { %v236_v36 = vpop.xlane.xlu2 %235  ;;  %v263_v37 = vsub.f32 %v1564_v41, %v244_v35 }
 0x110   :  { %v259_v25 = vsub.f32 %v1568_v45, %v236_v36 }
 0x111   :  { %v1636_v38 = vpop.eup %1371  ;;  %v291_v39 = vmul.f32 1.442695, %v263_v37 }
 0x112   :  { %v1638_v40 = vpop.eup %1373  ;;  %v283_v42 = vmul.f32 1.442695, %v259_v25  ;;  %299 = vadd.xlane.f32.xlu1 %v1636_v38 }
 0x113   :  { %1375 = vpow2.f32 %v291_v39  ;;  %307 = vadd.xlane.f32.xlu2 %v1638_v40 }
 0x114   :  { %1377 = vpow2.f32 %v283_v42 }
 0x115   :  { %v246_v32 = vpop.xlane.xlu1 %245 }
 0x116   :  { %v222_v33 = vpop.xlane.xlu0 %221  ;;  %v264_v48 = vsub.f32 %v1582_v57, %v246_v32 }
 0x117   :  { %v230_v43 = vpop.xlane.xlu2 %229  ;;  %v252_v44 = vsub.f32 %v1578_v54, %v222_v33 }
 0x118   :  { %v256_v41 = vsub.f32 %v1574_v53, %v230_v43  ;;  %v293_v51 = vmul.f32 1.442695, %v264_v48 }
 0x119   :  { %v1644_v45 = vpop.eup %1375  ;;  %v269_v46 = vmul.f32 1.442695, %v252_v44 }
 0x11a   :  { %v1646_v47 = vpop.eup %1377  ;;  %v277_v49 = vmul.f32 1.442695, %v256_v41  ;;  %323 = vadd.xlane.f32.xlu1 %v1644_v45 }
 0x11b   :  { %1379 = vpow2.f32 %v269_v46  ;;  %315 = vadd.xlane.f32.xlu0 %v1646_v47 }
 0x11c   :  { %1381 = vpow2.f32 %v277_v49 }
 0x11d   :  { %v224_v50 = vpop.xlane.xlu1 %223  ;;  %1383 = vpow2.f32 %v293_v51 }
 0x11e   :  { %v253_v52 = vsub.f32 %v1589_v0, %v224_v50  ;;  %v238_v54 = vpop.xlane.xlu0 %237 }
 0x11f   :  { %v248_v53 = vpop.xlane.xlu2 %247  ;;  %v260_v55 = vsub.f32 %v1593_v3, %v238_v54 }
 0x120   :  { %v271_v56 = vmul.f32 1.442695, %v253_v52  ;;  %v265_v60 = vsub.f32 %v1597_v5, %v248_v53 }
 0x121   :  { %v1653_v58 = vpop.eup %1379  ;;  %v285_v59 = vmul.f32 1.442695, %v260_v55 }
 0x122   :  { %v1655_v57 = vpop.eup %1381  ;;  %301 = vadd.xlane.f32.xlu2 %v1653_v58  ;;  %v295_v2 = vmul.f32 1.442695, %v265_v60 }
 0x123   :  { %1385 = vpow2.f32 %v285_v59  ;;  %309 = vadd.xlane.f32.xlu0 %v1655_v57  ;;  %v1662_v1 = vpop.eup %1383 }
 0x124   :  { %1387 = vpow2.f32 %v271_v56 }
 0x125   :  { %v240_v61 = vpop.xlane.xlu1 %239 }
 0x126   :  { %v261_v62 = vsub.f32 %v1604_v11, %v240_v61  ;;  %v232_v63 = vpop.xlane.xlu0 %231 }
 0x127   :  { %v257_v0 = vsub.f32 %v1608_v12, %v232_v63  ;;  %v242_v6 = vpop.xlane.xlu2 %241 }
 0x128   :  { %v287_v3 = vmul.f32 1.442695, %v261_v62  ;;  %v262_v5 = vsub.f32 %v1613_v17, %v242_v6 }
 0x129   :  { %v1664_v4 = vpop.eup %1385  ;;  %v279_v7 = vmul.f32 1.442695, %v257_v0 }
 0x12a   :  { %v1666_v8 = vpop.eup %1387  ;;  %1389 = vpow2.f32 %v287_v3  ;;  %325 = vadd.xlane.f32.xlu2 %v1662_v1  ;;  %317 = vadd.xlane.f32.xlu1 %v1664_v4  ;;  %v289_v12 = vmul.f32 1.442695, %v262_v5 }
 0x12b   :  { %1391 = vpow2.f32 %v279_v7  ;;  %303 = vadd.xlane.f32.xlu0 %v1666_v8 }
 0x12c   :  { %1393 = vpow2.f32 %v295_v2 }
 0x12d   :  { %v226_v9 = vpop.xlane.xlu1 %225 }
 0x12e   :  { %v254_v10 = vsub.f32 %v1619_v21, %v226_v9  ;;  %v250_v14 = vpop.xlane.xlu0 %249 }
 0x12f   :  { %v266_v18 = vsub.f32 %v1623_v22, %v250_v14 }
 0x130   :  { %v1673_v11 = vpop.eup %1389  ;;  %v273_v13 = vmul.f32 1.442695, %v254_v10 }
 0x131   :  { %v1675_v15 = vpop.eup %1391  ;;  %v297_v20 = vmul.f32 1.442695, %v266_v18  ;;  %v1437_v18 = vmov 2  }
 0x132   :  { %v1677_v16 = vpop.eup %1393  ;;  %319 = vadd.xlane.f32.xlu2 %v1673_v11  ;;  %311 = vadd.xlane.f32.xlu1 %v1675_v15  ;;  %1395 = vpow2.f32 %v273_v13 }
 0x133   :  { %327 = vadd.xlane.f32.xlu0 %v1677_v16  ;;  %1397 = vpow2.f32 %v289_v12 }
 0x135   :  { %v234_v17 = vpop.xlane.xlu1 %233 }
 0x136   :  { %v258_v19 = vsub.f32 %v1629_v26, %v234_v17  ;;  %v1435_v26 = vmov 1  }
 0x137   :  { %1294 = vset.pattern.permute.xlu1 %v1435_v26 }
 0x138   :  { %v281_v21 = vmul.f32 1.442695, %v258_v19  ;;  %v1684_v23 = vpop.eup %1395 }
 0x139   :  { %v1686_v24 = vpop.eup %1397 }
 0x13a   :  { %1399 = vpow2.f32 %v281_v21  ;;  %305 = vadd.xlane.f32.xlu1 %v1684_v23 }
 0x13b   :  { %1401 = vpow2.f32 %v297_v20  ;;  %321 = vadd.xlane.f32.xlu0 %v1686_v24 }
 0x140   :  { %v1690_v27 = vpop.eup %1399 }
 0x141   :  { %v1692_v22 = vpop.eup %1401  ;;  %313 = vadd.xlane.f32.xlu2 %v1690_v27 }
 0x142   :  { %329 = vadd.xlane.f32.xlu1 %v1692_v22 }
 0x185   :  { %v300_v29 = vpop.xlane.xlu1 %299 }
 0x186   :  { %v308_v30 = vpop.xlane.xlu2 %307  ;;  %1403 = vrcp.f32 %v300_v29  ;;  %v342_v33 = vand.u32 2147483648, %v300_v29  ;;  %v340_v43 = vand.u32 2147483647, %v300_v29  ;;  %vm336_vm4 = vweird.f32 %v300_v29 }
 0x187   :  { %1405 = vrcp.f32 %v308_v30  ;;  %v398_v56 = vand.u32 2147483648, %v308_v30  ;;  %vm392_vm8 = vweird.f32 %v308_v30  ;;  %v396_v59 = vand.u32 2147483647, %v308_v30 }
 0x188   :  { %v343_v50 = vor.u32 1.1754944e-38, %v342_v33  ;;  %vm341_vm6 = vcmp.eq.f32.partialorder %v340_v43, 8.507059e+37 }
 0x189   :  { %v399_v3 = vor.u32 1.1754944e-38, %v398_v56  ;;  %vm397_vm12 = vcmp.eq.f32.partialorder %v396_v59, 8.507059e+37 }
 0x18c   :  { %v1404_v31 = vpop.eup %1403 }
 0x18d   :  { %v1406_v34 = vpop.eup %1405  ;;  %v332_v35 = vmul.f32 %v1404_v31, %v300_v29  ;;  %v1699_v36 = vpop.xlane.xlu1 %323  ;;  %vm337_vm2 = vweird.f32 %v1404_v31 }
 0x18e   :  { %v388_v37 = vmul.f32 %v1406_v34, %v308_v30  ;;  %v316_v25 = vpop.xlane.xlu0 %315  ;;  %1407 = vrcp.f32 %v1699_v36  ;;  %vm338_vm5 = vmor %vm336_vm4, %vm337_vm2  ;;  %vm393_vm7 = vweird.f32 %v1406_v34  ;;  %v510_v17 = vand.u32 2147483648, %v1699_v36 }
 0x18f   :  { %v333_v39 = vsub.f32 1.0, %v332_v35  ;;  %1409 = vrcp.f32 %v316_v25  ;;  %vm394_vm9 = vmor %vm392_vm8, %vm393_vm7  ;;  %v454_v0 = vand.u32 2147483648, %v316_v25  ;;  %vm448_vm11 = vweird.f32 %v316_v25 }
 0x190   :  { %v389_v42 = vsub.f32 1.0, %v388_v37  ;;  %v452_v6 = vand.u32 2147483647, %v316_v25  ;;  %vm504_vm1 = vweird.f32 %v1699_v36  ;;  %v508_v20 = vand.u32 2147483647, %v1699_v36 }
 0x191   :  { %v334_v32 = vmul.f32 %v1404_v31, %v333_v39  ;;  %v511_v29 = vor.u32 1.1754944e-38, %v510_v17 }
 0x192   :  { %v390_v46 = vmul.f32 %v1406_v34, %v389_v42  ;;  %vm453_vm14 = vcmp.eq.f32.partialorder %v452_v6, 8.507059e+37  ;;  %vm509_vm2 = vcmp.eq.f32.partialorder %v508_v20, 8.507059e+37 }
 0x193   :  { %v335_v44 = vadd.f32 %v1404_v31, %v334_v32 }
 0x194   :  { %v1408_v41 = vpop.eup %1407  ;;  %v391_v54 = vadd.f32 %v1406_v34, %v390_v46 }
 0x195   :  { %v1410_v48 = vpop.eup %1409  ;;  %v339_v49 = vsel %vm338_vm5, %v1404_v31, %v335_v44  ;;  %v500_v55 = vmul.f32 %v1408_v41, %v1699_v36  ;;  %v302_v7 = vpop.xlane.xlu2 %301  ;;  %vm505_vm15 = vweird.f32 %v1408_v41 }
 0x196   :  { %v444_v51 = vmul.f32 %v1410_v48, %v316_v25  ;;  %v344_v52 = vsel %vm341_vm6, %v343_v50, %v339_v49  ;;  %vm449_vm10 = vweird.f32 %v1410_v48  ;;  %v395_v62 = vsel %vm394_vm9, %v1406_v34, %v391_v54  ;;  %vm506_vm3 = vmor %vm504_vm1, %vm505_vm15  ;;  %v310_v44 = vpop.xlane.xlu0 %309 }
 0x197   :  { %v1704_v61 = vmul.f32 %v1636_v38, %v344_v52  ;;  %v501_v2 = vsub.f32 1.0, %v500_v55  ;;  %vm450_vm13 = vmor %vm448_vm11, %vm449_vm10  ;;  %v400_v5 = vsel %vm397_vm12, %v399_v3, %v395_v62  ;;  %v455_v38 = vor.u32 1.1754944e-38, %v454_v0 }
 0x198   :  { %v445_v53 = vsub.f32 1.0, %v444_v51  ;;  %1411 = vrcp.f32 %v302_v7  ;;  %v559_v13 = vmul.f32 %v1638_v40, %v400_v5  ;;  %v2495_v34 = vmov 3  }
 0x199   :  { %716 = vperm.xlu1 %1294, %v1704_v61   ;;  %621 = vperm.xlu2 %1293, %v1704_v61   ;;  %v502_v10 = vmul.f32 %v1408_v41, %v501_v2  ;;  %v2493_v25 = vmov 4   ;;  %v356_v39 = vand.u32 2147483648, %v302_v7  ;;  %vm350_vm5 = vweird.f32 %v302_v7 }
 0x19a   :  { %v446_v60 = vmul.f32 %v1410_v48, %v445_v53  ;;  %v354_v42 = vand.u32 2147483647, %v302_v7  ;;  %v412_v6 = vand.u32 2147483648, %v310_v44 }
 0x19b   :  { %v503_v14 = vadd.f32 %v1408_v41, %v502_v10  ;;  %v357_v33 = vor.u32 1.1754944e-38, %v356_v39 }
 0x19c   :  { %v447_v63 = vadd.f32 %v1410_v48, %v446_v60  ;;  %vm355_vm7 = vcmp.eq.f32.partialorder %v354_v42, 8.507059e+37 }
 0x19d   :  { %v507_v40 = vsel %vm506_vm3, %v1408_v41, %v503_v14 }
 0x19e   :  { %v451_v9 = vsel %vm450_vm13, %v1410_v48, %v447_v63  ;;  %v1412_v21 = vpop.eup %1411  ;;  %v512_v31 = vsel %vm509_vm2, %v511_v29, %v507_v40  ;;  %vm406_vm13 = vweird.f32 %v310_v44 }
 0x19f   :  { %v456_v12 = vsel %vm453_vm14, %v455_v38, %v451_v9  ;;  %v346_v30 = vmul.f32 %v1412_v21, %v302_v7  ;;  %v1721_v35 = vmul.f32 %v1644_v45, %v512_v31  ;;  %vm351_vm4 = vweird.f32 %v1412_v21  ;;  %v318_v45 = vpop.xlane.xlu1 %317 }
 0x1a0   :  { %v1712_v19 = vmul.f32 %v1646_v47, %v456_v12  ;;  %vm352_vm6 = vmor %vm350_vm5, %vm351_vm4  ;;  %1413 = vrcp.f32 %v318_v45  ;;  %v468_v55 = vand.u32 2147483648, %v318_v45  ;;  %vm462_vm9 = vweird.f32 %v318_v45 }
 0x1a1   :  { %1296 = vset.pattern.permute.xlu1 %v1437_v18  ;;  %641 = vperm.xlu2 %1293, %v559_v13   ;;  %v347_v47 = vsub.f32 1.0, %v346_v30  ;;  %1415 = vrcp.f32 %v310_v44  ;;  %v466_v56 = vand.u32 2147483647, %v318_v45  ;;  %v410_v7 = vand.u32 2147483647, %v310_v44  ;;  %v1775_v30 = vpop.xlane.xlu0 %303 }
 0x1a2   :  { %876 = vperm.xlu1 %1296, %v1704_v61   ;;  %661 = vperm.xlu0 %1302, %v1712_v19   ;;  %v469_v63 = vor.u32 1.1754944e-38, %v468_v55  ;;  %v413_v12 = vor.u32 1.1754944e-38, %v412_v6 }
 0x1a3   :  { %v348_v36 = vmul.f32 %v1412_v21, %v347_v47  ;;  %vm467_vm11 = vcmp.eq.f32.partialorder %v466_v56, 8.507059e+37  ;;  %vm411_vm15 = vcmp.eq.f32.partialorder %v410_v7, 8.507059e+37  ;;  %v370_v56 = vand.u32 2147483648, %v1775_v30 }
 0x1a5   :  { %v349_v37 = vadd.f32 %v1412_v21, %v348_v36 }
 0x1a6   :  { %v1414_v46 = vpop.eup %1413 }
 0x1a7   :  { %v353_v32 = vsel %vm352_vm6, %v1412_v21, %v349_v37  ;;  %v458_v48 = vmul.f32 %v1414_v46, %v318_v45  ;;  %v1416_v49 = vpop.eup %1415  ;;  %vm463_vm8 = vweird.f32 %v1414_v46 }
 0x1a8   :  { %v358_v43 = vsel %vm355_vm7, %v357_v33, %v353_v32  ;;  %v402_v51 = vmul.f32 %v1416_v49, %v310_v44  ;;  %vm464_vm10 = vmor %vm462_vm9, %vm463_vm8  ;;  %vm407_vm12 = vweird.f32 %v1416_v49 }
 0x1a9   :  { %1295 = vset.pattern.permute.xlu2 %v1435_v26  ;;  %v1733_v41 = vmul.f32 %v1653_v58, %v358_v43  ;;  %v459_v50 = vsub.f32 1.0, %v458_v48  ;;  %v1743_v58 = vpop.xlane.xlu2 %325  ;;  %vm408_vm14 = vmor %vm406_vm13, %vm407_vm12 }
 0x1aa   :  { %1299 = vset.pattern.permute.xlu1 %v2495_v34  ;;  %732 = vperm.xlu2 %1295, %v559_v13   ;;  %1417 = vrcp.f32 %v1743_v58  ;;  %v403_v54 = vsub.f32 1.0, %v402_v51  ;;  %v524_v21 = vand.u32 2147483648, %v1743_v58  ;;  %vm518_vm3 = vweird.f32 %v1743_v58  ;;  %v328_v51 = vpop.xlane.xlu0 %327 }
 0x1ab   :  { %988 = vperm.xlu1 %1299, %v559_v13   ;;  %1305 = vset.pattern.permute.xlu0 %v1435_v26  ;;  %v460_v52 = vmul.f32 %v1414_v46, %v459_v50  ;;  %v522_v29 = vand.u32 2147483647, %v1743_v58 }
 0x1ac   :  { %764 = vperm.xlu0 %1305, %v1721_v35   ;;  %v404_v60 = vmul.f32 %v1416_v49, %v403_v54  ;;  %v525_v47 = vor.u32 1.1754944e-38, %v524_v21 }
 0x1ad   :  { %v461_v53 = vadd.f32 %v1414_v46, %v460_v52  ;;  %vm523_vm4 = vcmp.eq.f32.partialorder %v522_v29, 8.507059e+37 }
 0x1ae   :  { %v405_v2 = vadd.f32 %v1416_v49, %v404_v60  ;;  %v368_v60 = vand.u32 2147483647, %v1775_v30 }
 0x1af   :  { %v465_v62 = vsel %vm464_vm10, %v1414_v46, %v461_v53  ;;  %v1798_v46 = vld [vmem:[%s2491_s2] sm:$0xff]  ;;  %vm364_vm10 = vweird.f32 %v1775_v30 }
 0x1b0   :  { %v1418_v59 = vpop.eup %1417  ;;  %v470_v3 = vsel %vm467_vm11, %v469_v63, %v465_v62  ;;  %v409_v38 = vsel %vm408_vm14, %v1416_v49, %v405_v2  ;;  %v1814_v53 = vld [vmem:[%s2491_s2 + $0x60] sm:$0xff]  ;;  %v371_v63 = vor.u32 1.1754944e-38, %v370_v56  ;;  %vm369_vm12 = vcmp.eq.f32.partialorder %v368_v60, 8.507059e+37 }
 0x1b1   :  { %v514_v0 = vmul.f32 %v1418_v59, %v1743_v58  ;;  %v1761_v9 = vmul.f32 %v1664_v4, %v470_v3  ;;  %vm519_vm1 = vweird.f32 %v1418_v59  ;;  %vm532_vm14 = vweird.f32 %v328_v51 }
 0x1b2   :  { %1297 = vset.pattern.permute.xlu2 %v1437_v18  ;;  %vm520_vm2 = vmor %vm518_vm3, %vm519_vm1 }
 0x1b3   :  { %1301 = vset.pattern.permute.xlu1 %v2493_v25  ;;  %892 = vperm.xlu2 %1297, %v559_v13   ;;  %v515_v5 = vsub.f32 1.0, %v514_v0 }
 0x1b4   :  { %1148 = vperm.xlu1 %1301, %v559_v13   ;;  %1307 = vset.pattern.permute.xlu0 %v1437_v18  ;;  %v414_v13 = vsel %vm411_vm15, %v413_v12, %v409_v38 }
 0x1b5   :  { %924 = vperm.xlu0 %1307, %v1721_v35   ;;  %v516_v14 = vmul.f32 %v1418_v59, %v515_v5  ;;  %v560_v20 = vmul.f32 %v1655_v57, %v414_v13  ;;  %v1777_v57 = vpop.xlane.xlu2 %319 }
 0x1b7   :  { %v517_v4 = vadd.f32 %v1418_v59, %v516_v14  ;;  %v1848_v14 = vld [vmem:[%s2491_s2 + $0x68] sm:$0xff] }
 0x1b9   :  { %v521_v31 = vsel %vm520_vm2, %v1418_v59, %v517_v4  ;;  %v1853_v4 = vpop.xlane.xlu0 %321  ;;  %vm476_vm2 = vweird.f32 %v1777_v57 }
 0x1bb   :  { %1298 = vset.pattern.permute.xlu2 %v2495_v34 }
 0x1bc   :  { %1304 = vset.pattern.permute.xlu1 %v1435_v26  ;;  %972 = vperm.xlu2 %1298, %v1704_v61  }
 0x1bd   :  { %748 = vperm.xlu1 %1304, %v1712_v19   ;;  %1312 = vset.pattern.permute.xlu0 %v1436_v28  ;;  %v1789_v45 = vpop.xlane.xlu2 %313 }
 0x1be   :  { %626 = vperm.xlu0 %1312, %v1733_v41  }
 0x1c4   :  { %1300 = vset.pattern.permute.xlu2 %v2493_v25 }
 0x1c5   :  { %1306 = vset.pattern.permute.xlu1 %v1437_v18  ;;  %1132 = vperm.xlu2 %1300, %v1704_v61   ;;  %v1752_v61 = vpop.xlane.xlu1 %311 }
 0x1c6   :  { %908 = vperm.xlu1 %1306, %v1712_v19   ;;  %1314 = vset.pattern.permute.xlu0 %v1435_v26  ;;  %1419 = vrcp.f32 %v1752_v61  ;;  %v426_v37 = vand.u32 2147483648, %v1752_v61  ;;  %vm420_vm6 = vweird.f32 %v1752_v61  ;;  %v424_v42 = vand.u32 2147483647, %v1752_v61 }
 0x1c7   :  { %720 = vperm.xlu0 %1314, %v1733_v41   ;;  %1421 = vrcp.f32 %v1775_v30 }
 0x1c8   :  { %v427_v43 = vor.u32 1.1754944e-38, %v426_v37  ;;  %vm425_vm8 = vcmp.eq.f32.partialorder %v424_v42, 8.507059e+37  ;;  %1423 = vrcp.f32 %v328_v51 }
 0x1c9   :  { %1425 = vrcp.f32 %v1777_v57 }
 0x1ca   :  { %1427 = vrcp.f32 %v1789_v45 }
 0x1cb   :  { %1429 = vrcp.f32 %v1853_v4 }
 0x1cc   :  { %v1420_v10 = vpop.eup %1419 }
 0x1cd   :  { %1303 = vset.pattern.permute.xlu2 %v1436_v28  ;;  %v416_v17 = vmul.f32 %v1420_v10, %v1752_v61  ;;  %vm421_vm5 = vweird.f32 %v1420_v10  ;;  %v1422_v32 = vpop.eup %1421  ;;  %v1809_v54 = vpop.xlane.xlu1 %305 }
 0x1ce   :  { %1309 = vset.pattern.permute.xlu1 %v2495_v34  ;;  %681 = vperm.xlu2 %1303, %v1721_v35   ;;  %vm422_vm7 = vmor %vm420_vm6, %vm421_vm5  ;;  %v360_v44 = vmul.f32 %v1422_v32, %v1775_v30  ;;  %vm365_vm9 = vweird.f32 %v1422_v32  ;;  %v1424_v61 = vpop.eup %1423  ;;  %1431 = vrcp.f32 %v1809_v54 }
 0x1cf   :  { %1020 = vperm.xlu1 %1309, %v1721_v35   ;;  %1316 = vset.pattern.permute.xlu0 %v1437_v18  ;;  %v417_v40 = vsub.f32 1.0, %v416_v17  ;;  %vm366_vm11 = vmor %vm364_vm10, %vm365_vm9  ;;  %v528_v0 = vmul.f32 %v1424_v61, %v328_v51  ;;  %v1426_v38 = vpop.eup %1425  ;;  %vm533_vm13 = vweird.f32 %v1424_v61  ;;  %v538_v17 = vand.u32 2147483648, %v328_v51 }
 0x1d0   :  { %880 = vperm.xlu0 %1316, %v1733_v41   ;;  %v361_v48 = vsub.f32 1.0, %v360_v44  ;;  %v472_v12 = vmul.f32 %v1426_v38, %v1777_v57  ;;  %vm534_vm15 = vmor %vm532_vm14, %vm533_vm13  ;;  %vm477_vm3 = vweird.f32 %v1426_v38 }
 0x1d1   :  { %v529_v7 = vsub.f32 1.0, %v528_v0  ;;  %v539_v30 = vor.u32 1.1754944e-38, %v538_v17 }
 0x1d2   :  { %v362_v52 = vmul.f32 %v1422_v32, %v361_v48  ;;  %v480_v48 = vand.u32 2147483647, %v1777_v57 }
 0x1d4   :  { %vm481_vm5 = vcmp.eq.f32.partialorder %v480_v48, 8.507059e+37 }
 0x1d5   :  { %v1829_v3 = vpop.xlane.xlu1 %329 }
 0x1d6   :  { %1308 = vset.pattern.permute.xlu2 %v2495_v34  ;;  %1433 = vrcp.f32 %v1829_v3 }
 0x1d7   :  { %1311 = vset.pattern.permute.xlu1 %v2493_v25  ;;  %1004 = vperm.xlu2 %1308, %v1712_v19  }
 0x1d8   :  { %1180 = vperm.xlu1 %1311, %v1721_v35   ;;  %1324 = vset.pattern.permute.xlu0 %v1435_v26  ;;  %v526_v35 = vsel %vm523_vm4, %v525_v47, %v521_v31  ;;  %v1864_v47 = vld [vmem:[%s2491_s2 + $0x8] sm:$0xff]  ;;  %vm478_vm4 = vmor %vm476_vm2, %vm477_vm3  ;;  %vm546_vm2 = vweird.f32 %v1829_v3 }
 0x1d9   :  { %752 = vperm.xlu0 %1324, %v1761_v9   ;;  %v1785_v39 = vmul.f32 %v1662_v1, %v526_v35  ;;  %v1870_v35 = vld [vmem:[%s2491_s2 + $0xc0] sm:$0xff] }
 0x1df   :  { %1310 = vset.pattern.permute.xlu2 %v2493_v25 }
 0x1e0   :  { %1313 = vset.pattern.permute.xlu1 %v1436_v28  ;;  %1164 = vperm.xlu2 %1310, %v1712_v19   ;;  %v418_v19 = vmul.f32 %v1420_v10, %v417_v40  ;;  %v536_v40 = vand.u32 2147483647, %v328_v51 }
 0x1e1   :  { %646 = vperm.xlu1 %1313, %v560_v20   ;;  %1326 = vset.pattern.permute.xlu0 %v1437_v18 }
 0x1e2   :  { %912 = vperm.xlu0 %1326, %v1761_v9   ;;  %v419_v36 = vadd.f32 %v1420_v10, %v418_v19  ;;  %vm537_vm1 = vcmp.eq.f32.partialorder %v536_v40, 8.507059e+37 }
 0x1e4   :  { %v423_v33 = vsel %vm422_vm7, %v1420_v10, %v419_v36  ;;  %v530_v10 = vmul.f32 %v1424_v61, %v529_v7  ;;  %vm434_vm7 = vweird.f32 %v1789_v45 }
 0x1e5   :  { %v428_v1 = vsel %vm425_vm8, %v427_v43, %v423_v33  ;;  %v482_v43 = vand.u32 2147483648, %v1777_v57 }
 0x1e6   :  { %v1802_v49 = vmul.f32 %v1675_v15, %v428_v1  ;;  %v363_v15 = vadd.f32 %v1422_v32, %v362_v52 }
 0x1e7   :  { %v483_v52 = vor.u32 1.1754944e-38, %v482_v43 }
 0x1e8   :  { %1319 = vset.pattern.permute.xlu2 %v2495_v34  ;;  %v367_v62 = vsel %vm366_vm11, %v1422_v32, %v363_v15  ;;  %vm490_vm11 = vweird.f32 %v1853_v4 }
 0x1e9   :  { %1315 = vset.pattern.permute.xlu1 %v1435_v26  ;;  %992 = vperm.xlu2 %1319, %v560_v20   ;;  %v372_v2 = vsel %vm369_vm12, %v371_v63, %v367_v62  ;;  %v1912_v63 = vld [vmem:[%s2491_s2 + $0x128] sm:$0xff] }
 0x1ea   :  { %736 = vperm.xlu1 %1315, %v560_v20   ;;  %1329 = vset.pattern.permute.xlu0 %v2495_v34  ;;  %v1837_v5 = vmul.f32 %v1666_v8, %v372_v2  ;;  %v531_v8 = vadd.f32 %v1424_v61, %v530_v10 }
 0x1eb   :  { %1024 = vperm.xlu0 %1329, %v1785_v39  }
 0x1ec   :  { %v535_v29 = vsel %vm534_vm15, %v1424_v61, %v531_v8  ;;  %v438_v8 = vand.u32 2147483647, %v1789_v45  ;;  %vm378_vm15 = vweird.f32 %v1809_v54 }
 0x1ed   :  { %v540_v19 = vsel %vm537_vm1, %v539_v30, %v535_v29 }
 0x1ee   :  { %v1885_v1 = vmul.f32 %v1677_v16, %v540_v19  ;;  %vm439_vm9 = vcmp.eq.f32.partialorder %v438_v8, 8.507059e+37 }
 0x1f1   :  { %1321 = vset.pattern.permute.xlu2 %v2493_v25 }
 0x1f2   :  { %1317 = vset.pattern.permute.xlu1 %v1437_v18  ;;  %1152 = vperm.xlu2 %1321, %v560_v20  }
 0x1f3   :  { %v622_v50 = vpop.permute.xlu2 %621  ;;  %896 = vperm.xlu1 %1317, %v560_v20   ;;  %1334 = vset.pattern.permute.xlu0 %v1435_v26  ;;  %v473_v20 = vsub.f32 1.0, %v472_v12 }
 0x1f4   :  { %v1806_v58 = vmul.f32 %v622_v50, %v1798_v46  ;;  %740 = vperm.xlu0 %1334, %v1802_v49   ;;  %v1428_v50 = vpop.eup %1427 }
 0x1f5   :  { %v474_v31 = vmul.f32 %v1426_v38, %v473_v20  ;;  %v430_v15 = vmul.f32 %v1428_v50, %v1789_v45  ;;  %vm435_vm6 = vweird.f32 %v1428_v50 }
 0x1f6   :  { %vm436_vm8 = vmor %vm434_vm7, %vm435_vm6 }
 0x1f7   :  { %v475_v42 = vadd.f32 %v1426_v38, %v474_v31  ;;  %v431_v57 = vsub.f32 1.0, %v430_v15 }
 0x1f9   :  { %v479_v51 = vsel %vm478_vm4, %v1426_v38, %v475_v42  ;;  %v432_v62 = vmul.f32 %v1428_v50, %v431_v57  ;;  %v440_v38 = vand.u32 2147483648, %v1789_v45  ;;  %v1943_v45 = vld [vmem:[%s2491_s2 + $0x18] sm:$0xff] }
 0x1fa   :  { %1322 = vset.pattern.permute.xlu2 %v1436_v28 }
 0x1fb   :  { %v642_v55 = vpop.permute.xlu2 %641  ;;  %1318 = vset.pattern.permute.xlu1 %v2495_v34  ;;  %666 = vperm.xlu2 %1322, %v1761_v9   ;;  %v441_v20 = vor.u32 1.1754944e-38, %v440_v38  ;;  %v494_v38 = vand.u32 2147483647, %v1853_v4 }
 0x1fc   :  { %v1821_v59 = vmul.f32 %v642_v55, %v1814_v53  ;;  %976 = vperm.xlu1 %1318, %v1733_v41   ;;  %1336 = vset.pattern.permute.xlu0 %v1437_v18  ;;  %v484_v55 = vsel %vm481_vm5, %v483_v52, %v479_v51 }
 0x1fd   :  { %900 = vperm.xlu0 %1336, %v1802_v49   ;;  %v1903_v61 = vmul.f32 %v1673_v11, %v484_v55  ;;  %v433_v11 = vadd.f32 %v1428_v50, %v432_v62  ;;  %vm495_vm13 = vcmp.eq.f32.partialorder %v494_v38, 8.507059e+37  ;;  %v550_v38 = vand.u32 2147483647, %v1829_v3 }
 0x1ff   :  { %v437_v17 = vsel %vm436_vm8, %v1428_v50, %v433_v11  ;;  %vm551_vm6 = vcmp.eq.f32.partialorder %v550_v38, 8.507059e+37 }
 0x203   :  { %1325 = vset.pattern.permute.xlu2 %v1435_v26 }
 0x204   :  { %v1832_v6 = vpop.permute.xlu2 %732  ;;  %1320 = vset.pattern.permute.xlu1 %v2493_v25  ;;  %768 = vperm.xlu2 %1325, %v1785_v39  }
 0x205   :  { %1136 = vperm.xlu1 %1320, %v1733_v41   ;;  %1337 = vset.pattern.permute.xlu0 %v2495_v34 }
 0x206   :  { %980 = vperm.xlu0 %1337, %v1837_v5  }
 0x20b   :  { %v1843_v13 = vpop.permute.xlu1 %716 }
 0x20c   :  { %1327 = vset.pattern.permute.xlu2 %v1437_v18 }
 0x20d   :  { %v893_v41 = vpop.permute.xlu2 %892  ;;  %1323 = vset.pattern.permute.xlu1 %v1436_v28  ;;  %928 = vperm.xlu2 %1327, %v1785_v39  }
 0x20e   :  { %v1856_v21 = vmul.f32 %v893_v41, %v1848_v14  ;;  %686 = vperm.xlu1 %1323, %v1785_v39   ;;  %1339 = vset.pattern.permute.xlu0 %v2493_v25  ;;  %v1430_v41 = vpop.eup %1429 }
 0x20f   :  { %1140 = vperm.xlu0 %1339, %v1837_v5   ;;  %v486_v40 = vmul.f32 %v1430_v41, %v1853_v4  ;;  %v1948_v30 = vpop.eup %1431  ;;  %vm491_vm10 = vweird.f32 %v1430_v41 }
 0x210   :  { %v1962_v43 = vpop.eup %1433  ;;  %v374_v48 = vmul.f32 %v1948_v30, %v1809_v54  ;;  %vm492_vm12 = vmor %vm490_vm11, %vm491_vm10  ;;  %vm379_vm14 = vweird.f32 %v1948_v30 }
 0x211   :  { %v542_v51 = vmul.f32 %v1962_v43, %v1829_v3  ;;  %vm2005_vm1 = vmor %vm378_vm15, %vm379_vm14  ;;  %vm547_vm3 = vweird.f32 %v1962_v43 }
 0x212   :  { %v375_v52 = vsub.f32 1.0, %v374_v48  ;;  %vm548_vm5 = vmor %vm546_vm2, %vm547_vm3 }
 0x214   :  { %v877_v36 = vpop.permute.xlu1 %876  ;;  %v662_v32 = vpop.permute.xlu0 %661  ;;  %v376_v8 = vmul.f32 %v1948_v30, %v375_v52 }
 0x215   :  { %v1873_v37 = vmul.f32 %v877_v36, %v1864_v47  ;;  %1332 = vset.pattern.permute.xlu2 %v1436_v28  ;;  %v1882_v44 = vmul.f32 %v662_v32, %v1870_v35  ;;  %v487_v36 = vsub.f32 1.0, %v486_v40 }
 0x216   :  { %v1876_v33 = vpop.permute.xlu2 %972  ;;  %1328 = vset.pattern.permute.xlu1 %v2495_v34  ;;  %651 = vperm.xlu2 %1332, %v1802_v49  }
 0x217   :  { %1008 = vperm.xlu1 %1328, %v1761_v9   ;;  %1342 = vset.pattern.permute.xlu0 %v1436_v28  ;;  %v488_v50 = vmul.f32 %v1430_v41, %v487_v36 }
 0x218   :  { %691 = vperm.xlu0 %1342, %v1885_v1  }
 0x219   :  { %v489_v57 = vadd.f32 %v1430_v41, %v488_v50 }
 0x21d   :  { %v1893_v16 = vpop.permute.xlu1 %988 }
 0x21e   :  { %1333 = vset.pattern.permute.xlu2 %v1435_v26  ;;  %v1896_v56 = vpop.permute.xlu0 %764 }
 0x21f   :  { %v1898_v60 = vpop.permute.xlu2 %1132  ;;  %1330 = vset.pattern.permute.xlu1 %v2493_v25  ;;  %724 = vperm.xlu2 %1333, %v1837_v5  }
 0x220   :  { %1168 = vperm.xlu1 %1330, %v1761_v9   ;;  %1347 = vset.pattern.permute.xlu0 %v2495_v34  ;;  %v1920_v9 = vld [vmem:[%s2491_s2 + $0x120] sm:$0xff] }
 0x221   :  { %1012 = vperm.xlu0 %1347, %v1903_v61  }
 0x226   :  { %v1914_v0 = vpop.permute.xlu1 %1148 }
 0x227   :  { %1335 = vset.pattern.permute.xlu2 %v1437_v18  ;;  %v925_v2 = vpop.permute.xlu0 %924 }
 0x228   :  { %v682_v7 = vpop.permute.xlu2 %681  ;;  %1331 = vset.pattern.permute.xlu1 %v1436_v28  ;;  %884 = vperm.xlu2 %1335, %v1837_v5   ;;  %v1926_v10 = vmul.f32 %v925_v2, %v1912_v63  ;;  %v496_v2 = vand.u32 2147483648, %v1853_v4  ;;  %v1998_v4 = vld [vmem:[%s2491_s2 + $0x20] sm:$0xff] }
 0x229   :  { %v1929_v12 = vmul.f32 %v682_v7, %v1920_v9  ;;  %631 = vperm.xlu1 %1331, %v1837_v5   ;;  %1349 = vset.pattern.permute.xlu0 %v2493_v25  ;;  %v442_v5 = vsel %vm439_vm9, %v441_v20, %v437_v17  ;;  %v543_v7 = vsub.f32 1.0, %v542_v51  ;;  %v493_v17 = vsel %vm492_vm12, %v1430_v41, %v489_v57 }
 0x22a   :  { %1172 = vperm.xlu0 %1349, %v1903_v61   ;;  %v1958_v32 = vmul.f32 %v1690_v27, %v442_v5  ;;  %v1972_v27 = vld [vmem:[%s2491_s2 + $0xc8] sm:$0xff]  ;;  %v497_v20 = vor.u32 1.1754944e-38, %v496_v2  ;;  %v377_v5 = vadd.f32 %v1948_v30, %v376_v8  ;;  %v382_v41 = vand.u32 2147483647, %v1809_v54 }
 0x22b   :  { %v544_v40 = vmul.f32 %v1962_v43, %v543_v7 }
 0x22c   :  { %vm383_vm4 = vcmp.eq.f32.partialorder %v382_v41, 8.507059e+37 }
 0x22d   :  { %v545_v50 = vadd.f32 %v1962_v43, %v544_v40 }
 0x22f   :  { %v1945_v29 = vpop.permute.xlu1 %748  ;;  %v549_v8 = vsel %vm548_vm5, %v1962_v43, %v545_v50  ;;  %v2054_v43 = vld [vmem:[%s2491_s2 + $0xe0] sm:$0xff] }
 0x230   :  { %1343 = vset.pattern.permute.xlu2 %v1435_v26  ;;  %v627_v31 = vpop.permute.xlu0 %626 }
 0x231   :  { %v1950_v19 = vpop.permute.xlu2 %1004  ;;  %1338 = vset.pattern.permute.xlu1 %v2495_v34  ;;  %756 = vperm.xlu2 %1343, %v1903_v61   ;;  %v1955_v42 = vmul.f32 %v627_v31, %v1943_v45  ;;  %v384_v31 = vand.u32 2147483648, %v1809_v54  ;;  %v381_v54 = vsel %vm2005_vm1, %v1948_v30, %v377_v5 }
 0x232   :  { %996 = vperm.xlu1 %1338, %v1802_v49   ;;  %1357 = vset.pattern.permute.xlu0 %v2495_v34 }
 0x233   :  { %1000 = vperm.xlu0 %1357, %v1958_v32   ;;  %v385_v7 = vor.u32 1.1754944e-38, %v384_v31 }
 0x235   :  { %v386_v30 = vsel %vm383_vm4, %v385_v7, %v381_v54 }
 0x238   :  { %v909_v15 = vpop.permute.xlu1 %908 }
 0x239   :  { %v1975_v55 = vmul.f32 %v909_v15, %v1972_v27  ;;  %1345 = vset.pattern.permute.xlu2 %v1437_v18  ;;  %v1978_v62 = vpop.permute.xlu0 %720  ;;  %v552_v15 = vand.u32 2147483648, %v1829_v3 }
 0x23a   :  { %v1980_v11 = vpop.permute.xlu2 %1164  ;;  %1340 = vset.pattern.permute.xlu1 %v2493_v25  ;;  %916 = vperm.xlu2 %1345, %v1903_v61  }
 0x23b   :  { %1156 = vperm.xlu1 %1340, %v1802_v49   ;;  %1359 = vset.pattern.permute.xlu0 %v2493_v25  ;;  %v498_v49 = vsel %vm495_vm13, %v497_v20, %v493_v17  ;;  %v558_v20 = vmul.f32 %v1684_v23, %v386_v30  ;;  %v586_v23 = vld [vmem:[%s2491_s2 + $0x78] sm:$0xff]  ;;  %v2090_v30 = vld [vmem:[%s2491_s2 + $0x80] sm:$0xff] }
 0x23c   :  { %1160 = vperm.xlu0 %1359, %v1958_v32   ;;  %v2023_v2 = vmul.f32 %v1686_v24, %v498_v49  ;;  %v553_v24 = vor.u32 1.1754944e-38, %v552_v15  ;;  %v1035_v15 = vmul.f32 %v1876_v33, %v1864_v47  ;;  %v787_v33 = vmul.f32 %v1945_v29, %v1870_v35 }
 0x23e   :  { %v554_v17 = vsel %vm551_vm6, %v553_v24, %v549_v8 }
 0x23f   :  { %v2043_v5 = vmul.f32 %v1692_v22, %v554_v17  ;;  %v2062_v22 = vld [vmem:[%s2491_s2 + $0xd8] sm:$0xff] }
 0x241   :  { %v2000_v36 = vpop.permute.xlu1 %1020 }
 0x242   :  { %1348 = vset.pattern.permute.xlu2 %v2495_v34  ;;  %v881_v51 = vpop.permute.xlu0 %880  ;;  %v1047_v29 = vmul.f32 %v2000_v36, %v1912_v63 }
 0x243   :  { %v2011_v52 = vpop.permute.xlu2 %992  ;;  %1341 = vset.pattern.permute.xlu1 %v1436_v28  ;;  %1028 = vperm.xlu2 %1348, %v1885_v1   ;;  %v2020_v57 = vmul.f32 %v881_v51, %v1998_v4 }
 0x244   :  { %671 = vperm.xlu1 %1341, %v1903_v61   ;;  %1360 = vset.pattern.permute.xlu0 %v1436_v28 }
 0x245   :  { %676 = vperm.xlu0 %1360, %v2023_v2  }
 0x24a   :  { %v2033_v61 = vpop.permute.xlu1 %1180 }
 0x24b   :  { %1350 = vset.pattern.permute.xlu2 %v1436_v28  ;;  %v2037_v3 = vpop.permute.xlu0 %752 }
 0x24c   :  { %v2039_v40 = vpop.permute.xlu2 %1152  ;;  %1344 = vset.pattern.permute.xlu1 %v1435_v26  ;;  %636 = vperm.xlu2 %1350, %v558_v20  }
 0x24d   :  { %772 = vperm.xlu1 %1344, %v1885_v1   ;;  %1363 = vset.pattern.permute.xlu0 %v1435_v26 }
 0x24e   :  { %776 = vperm.xlu0 %1363, %v2043_v5  }
 0x253   :  { %v647_v49 = vpop.permute.xlu1 %646 }
 0x254   :  { %v2056_v31 = vmul.f32 %v647_v49, %v586_v23  ;;  %1353 = vset.pattern.permute.xlu2 %v1435_v26  ;;  %v913_v41 = vpop.permute.xlu0 %912  ;;  %v2115_v49 = vld [vmem:[%s2491_s2 + $0x98] sm:$0xff] }
 0x255   :  { %v667_v48 = vpop.permute.xlu2 %666  ;;  %1346 = vset.pattern.permute.xlu1 %v1437_v18  ;;  %744 = vperm.xlu2 %1353, %v1958_v32   ;;  %v2067_v50 = vmul.f32 %v913_v41, %v2054_v43 }
 0x256   :  { %v2070_v51 = vmul.f32 %v667_v48, %v2062_v22  ;;  %932 = vperm.xlu1 %1346, %v1885_v1   ;;  %1365 = vset.pattern.permute.xlu0 %v1437_v18  ;;  %v2123_v48 = vld [vmem:[%s2491_s2 + $0x90] sm:$0xff] }
 0x257   :  { %936 = vperm.xlu0 %1365, %v2043_v5  }
 0x25c   :  { %v737_v54 = vpop.permute.xlu1 %736 }
 0x25d   :  { %1355 = vset.pattern.permute.xlu2 %v1437_v18  ;;  %v2078_v7 = vpop.permute.xlu0 %1024 }
 0x25e   :  { %v2080_v38 = vpop.permute.xlu2 %768  ;;  %1351 = vset.pattern.permute.xlu1 %v1436_v28  ;;  %904 = vperm.xlu2 %1355, %v1958_v32  }
 0x25f   :  { %656 = vperm.xlu1 %1351, %v1958_v32   ;;  %1067 = vrot.lane.b32.xlu0 %v1035_v15, %s1440_s29  ;;  %v2101_v32 = vld [vmem:[%s2491_s2 + $0x140] sm:$0xff] }
 0x260   :  { %1369 = vset.pattern.permute.xlu0 %v2493_v25 }
 0x265   :  { %v897_v47 = vpop.permute.xlu1 %896 }
 0x266   :  { %v2095_v8 = vmul.f32 %v897_v47, %v2090_v30  ;;  %1356 = vset.pattern.permute.xlu2 %v2495_v34  ;;  %v2103_v24 = vpop.permute.xlu0 %740 }
 0x267   :  { %v929_v17 = vpop.permute.xlu2 %928  ;;  %1352 = vset.pattern.permute.xlu1 %v1435_v26  ;;  %984 = vperm.xlu2 %1356, %v558_v20  }
 0x268   :  { %827 = vrot.lane.b32.xlu0 %v787_v33, %s1440_s29  ;;  %v2108_v35 = vmul.f32 %v929_v17, %v2101_v32  ;;  %728 = vperm.xlu1 %1352, %v558_v20   ;;  %v784_v33 = vmul.f32 %v737_v54, %v586_v23 }
 0x26a   :  { %2498 = vst [vmem:[#allocation2_spill] sm:$0xff] %v2108_v35 }
 0x26e   :  { %v2117_v41 = vpop.permute.xlu1 %976 }
 0x26f   :  { %1358 = vset.pattern.permute.xlu2 %v2493_v25  ;;  %v901_v15 = vpop.permute.xlu0 %900 }
 0x270   :  { %1091 = vrot.lane.b32.xlu0 %v1047_v29, %s1440_s29  ;;  %v652_v47 = vpop.permute.xlu2 %651  ;;  %1354 = vset.pattern.permute.xlu1 %v1437_v18  ;;  %v2128_v63 = vmul.f32 %v901_v15, %v2115_v49  ;;  %v2150_v15 = vld [vmem:[%s2491_s2 + $0x38] sm:$0xff] }
 0x271   :  { %v2131_v36 = vmul.f32 %v652_v47, %v2123_v48  ;;  %1144 = vperm.xlu2 %1358, %v558_v20   ;;  %888 = vperm.xlu1 %1354, %v558_v20   ;;  %v610_v20 = vld [vmem:[%s2491_s2 + $0x138] sm:$0xff] }
 0x272   :  { %2499 = vst [vmem:[#allocation3_spill] sm:$0xff] %v2128_v63  ;;  %v779_v63 = vmul.f32 %v1843_v13, %v1798_v46  ;;  %v1039_v46 = vmul.f32 %v1893_v16, %v1848_v14  ;;  %v2219_v16 = vld [vmem:[%s2491_s2 + $0x48] sm:$0xff] }
 0x277   :  { %v2133_v17 = vpop.permute.xlu1 %1136 }
 0x278   :  { %821 = vrot.lane.b32.xlu0 %v784_v33, %s1440_s29  ;;  %v2136_v25 = vpop.permute.xlu0 %980  ;;  %v2164_v33 = vld [vmem:[%s2491_s2 + $0x150] sm:$0xff] }
 0x279   :  { %1361 = vset.pattern.permute.xlu2 %v1436_v28  ;;  %v725_v29 = vpop.permute.xlu2 %724  ;;  %1362 = vset.pattern.permute.xlu1 %v1435_v26 }
 0x27a   :  { %696 = vperm.xlu2 %1361, %v2043_v5   ;;  %760 = vperm.xlu1 %1362, %v2023_v2  }
 0x280   :  { %v687_v23 = vpop.permute.xlu1 %686 }
 0x281   :  { %v2145_v54 = vmul.f32 %v687_v23, %v610_v20  ;;  %v2152_v28 = vpop.permute.xlu0 %1140 }
 0x282   :  { %2501 = vst [vmem:[#allocation5_spill] sm:$0xff] %v2152_v28  ;;  %1366 = vset.pattern.permute.xlu2 %v2495_v34  ;;  %v885_v26 = vpop.permute.xlu2 %884  ;;  %1364 = vset.pattern.permute.xlu1 %v1437_v18  ;;  %v2502_v34 = vmov 4   ;;  %v2503_v18 = vmov 3  }
 0x283   :  { %2500 = vst [vmem:[#allocation4_spill] sm:$0xff] %v2145_v54  ;;  %v2157_v47 = vmul.f32 %v885_v26, %v2150_v15  ;;  %1016 = vperm.xlu2 %1366, %v2023_v2   ;;  %920 = vperm.xlu1 %1364, %v2023_v2  }
 0x289   :  { %v1009_v23 = vpop.permute.xlu1 %1008 }
 0x28a   :  { %v1044_v28 = vmul.f32 %v1009_v23, %v2054_v43  ;;  %v692_v35 = vpop.permute.xlu0 %691  ;;  %v577_v43 = vld [vmem:[%s2491_s2 + $0x30] sm:$0xff]  ;;  %v783_v23 = vmul.f32 %v1832_v6, %v1814_v53  ;;  %v1043_v6 = vmul.f32 %v1950_v19, %v1972_v27 }
 0x28b   :  { %1368 = vset.pattern.permute.xlu2 %v2502_v34  ;;  %v2168_v54 = vpop.permute.xlu2 %756  ;;  %1367 = vset.pattern.permute.xlu1 %v2503_v18  ;;  %v2172_v26 = vmul.f32 %v692_v35, %v2164_v33  ;;  %v781_v35 = vmul.f32 %v725_v29, %v577_v43 }
 0x28c   :  { %1176 = vperm.xlu2 %1368, %v2023_v2   ;;  %1032 = vperm.xlu1 %1367, %v2043_v5   ;;  %v2189_v2 = vld [vmem:[%s2491_s2 + $0xf8] sm:$0xff] }
 0x28d   :  { %2504 = vst [vmem:[#allocation6_spill] sm:$0xff] %v2172_v26  ;;  %1085 = vrot.lane.b32.xlu0 %v1044_v28, %s1440_s29 }
 0x292   :  { %v2184_v18 = vpop.permute.xlu1 %1168 }
 0x293   :  { %v2191_v26 = vpop.permute.xlu0 %1012 }
 0x294   :  { %811 = vrot.lane.b32.xlu2 %v779_v63, %s1440_s29  ;;  %v917_v28 = vpop.permute.xlu2 %916  ;;  %819 = vrot.lane.b32.xlu1 %v783_v23, %s1440_s29 }
 0x295   :  { %v2196_v53 = vmul.f32 %v917_v28, %v2189_v2  ;;  %815 = vrot.lane.b32.xlu0 %v781_v35, %s1440_s29  ;;  %1370 = vset.pattern.permute.xlu1 %v2502_v34  ;;  %v791_v35 = vmul.f32 %v1896_v56, %v1920_v9  ;;  %v780_v34 = vmul.f32 %v1978_v62, %v1943_v45 }
 0x296   :  { %v1040_v9 = vmul.f32 %v2011_v52, %v2090_v30  ;;  %v1036_v45 = vmul.f32 %v2117_v41, %v1998_v4  ;;  %v601_v4 = vld [vmem:[%s2491_s2 + $0xf0] sm:$0xff]  ;;  %v2249_v52 = vld [vmem:[%s2491_s2 + $0x108] sm:$0xff] }
 0x29b   :  { %v632_v13 = vpop.permute.xlu1 %631 }
 0x29c   :  { %1075 = vrot.lane.b32.xlu2 %v1039_v46, %s1440_s29  ;;  %v2205_v63 = vmul.f32 %v632_v13, %v577_v43  ;;  %1083 = vrot.lane.b32.xlu1 %v1043_v6, %s1440_s29  ;;  %v2208_v29 = vpop.permute.xlu0 %1172  ;;  %v788_v46 = vmul.f32 %v2037_v3, %v2062_v22  ;;  %v792_v6 = vmul.f32 %v2080_v38, %v610_v20  ;;  %v593_v3 = vld [vmem:[%s2491_s2 + $0xb0] sm:$0xff] }
 0x29d   :  { %v1029_v23 = vpop.permute.xlu2 %1028 }
 0x2a4   :  { %835 = vrot.lane.b32.xlu2 %v791_v35, %s1440_s29  ;;  %813 = vrot.lane.b32.xlu1 %v780_v34, %s1440_s29  ;;  %v997_v14 = vpop.permute.xlu1 %996  ;;  %v1048_v35 = vmul.f32 %v2078_v7, %v2101_v32  ;;  %v1037_v34 = vmul.f32 %v2136_v25, %v2150_v15  ;;  %v581_v25 = vld [vmem:[%s2491_s2 + $0x50] sm:$0xff]  ;;  %v614_v7 = vld [vmem:[%s2491_s2 + $0x158] sm:$0xff]  ;;  %v1045_v15 = vmul.f32 %v2191_v26, %v2189_v2 }
 0x2a5   :  { %v1041_v19 = vmul.f32 %v997_v14, %v2115_v49  ;;  %v2222_v27 = vpop.permute.xlu0 %1000  ;;  %v616_v2 = vld [vmem:[%s2491_s2 + $0x168] sm:$0xff] }
 0x2a6   :  { %v637_v43 = vpop.permute.xlu2 %636 }
 0x2a7   :  { %v2225_v56 = vmul.f32 %v637_v43, %v2219_v16  ;;  %1079 = vrot.lane.b32.xlu0 %v1041_v19, %s1440_s29 }
 0x2ac   :  { %1069 = vrot.lane.b32.xlu2 %v1036_v45, %s1440_s29  ;;  %1077 = vrot.lane.b32.xlu1 %v1040_v9, %s1440_s29  ;;  %v785_v45 = vmul.f32 %v2103_v24, %v2123_v48  ;;  %v617_v24 = vld [vmem:[%s2491_s2 + $0x170] sm:$0xff] }
 0x2ad   :  { %v2234_v62 = vpop.permute.xlu1 %1156 }
 0x2ae   :  { %v2236_v49 = vpop.permute.xlu0 %1160 }
 0x2af   :  { %v745_v28 = vpop.permute.xlu2 %744 }
 0x2b4   :  { %829 = vrot.lane.b32.xlu2 %v788_v46, %s1440_s29  ;;  %837 = vrot.lane.b32.xlu1 %v792_v6, %s1440_s29  ;;  %v789_v46 = vmul.f32 %v2168_v54, %v601_v4 }
 0x2b6   :  { %v672_v30 = vpop.permute.xlu1 %671 }
 0x2b7   :  { %v2251_v41 = vmul.f32 %v672_v30, %v601_v4  ;;  %v677_v22 = vpop.permute.xlu0 %676 }
 0x2b8   :  { %v905_v38 = vpop.permute.xlu2 %904  ;;  %v2257_v20 = vmul.f32 %v677_v22, %v2249_v52  ;;  %v592_v22 = vld [vmem:[%s2491_s2 + $0xa8] sm:$0xff] }
 0x2b9   :  { %v2259_v13 = vmul.f32 %v905_v38, %v593_v3 }
 0x2bc   :  { %1093 = vrot.lane.b32.xlu2 %v1048_v35, %s1440_s29  ;;  %1071 = vrot.lane.b32.xlu1 %v1037_v34, %s1440_s29  ;;  %v786_v35 = vmul.f32 %v745_v28, %v592_v22  ;;  %v605_v28 = vld [vmem:[%s2491_s2 + $0x110] sm:$0xff] }
 0x2bf   :  { %v773_v14 = vpop.permute.xlu1 %772 }
 0x2c0   :  { %v793_v19 = vmul.f32 %v773_v14, %v2164_v33  ;;  %v777_v43 = vpop.permute.xlu0 %776  ;;  %v1049_v33 = vmul.f32 %v1029_v23, %v614_v7 }
 0x2c1   :  { %v985_v9 = vpop.permute.xlu2 %984 }
 0x2c2   :  { %839 = vrot.lane.b32.xlu0 %v793_v19, %s1440_s29  ;;  %v1038_v32 = vmul.f32 %v985_v9, %v581_v25 }
 0x2c4   :  { %823 = vrot.lane.b32.xlu2 %v785_v45, %s1440_s29  ;;  %831 = vrot.lane.b32.xlu1 %v789_v46, %s1440_s29 }
 0x2c8   :  { %v933_v48 = vpop.permute.xlu1 %932 }
 0x2c9   :  { %v2283_v54 = vmul.f32 %v933_v48, %v614_v7  ;;  %v937_v6 = vpop.permute.xlu0 %936 }
 0x2ca   :  { %1073 = vrot.lane.b32.xlu0 %v1038_v32, %s1440_s29  ;;  %v2288_v4 = vmul.f32 %v937_v6, %v617_v24 }
 0x2cb   :  { %v2290_v30 = vpop.permute.xlu2 %1144 }
 0x2cc   :  { %1087 = vrot.lane.b32.xlu2 %v1045_v15, %s1440_s29  ;;  %1095 = vrot.lane.b32.xlu1 %v1049_v33, %s1440_s29  ;;  %v1042_v33 = vmul.f32 %v2222_v27, %v593_v3 }
 0x2d1   :  { %v657_v38 = vpop.permute.xlu1 %656  ;;  %v1068_v34 = vpop.permute.xlu0 %1067 }
 0x2d2   :  { %v2297_v26 = vmul.f32 %v657_v38, %v592_v22  ;;  %v794_v38 = vmul.f32 %v777_v43, %v616_v2 }
 0x2d4   :  { %v697_v23 = vpop.permute.xlu2 %696  ;;  %825 = vrot.lane.b32.xlu1 %v786_v35, %s1440_s29 }
 0x2d5   :  { %v2303_v14 = vmul.f32 %v697_v23, %v616_v2 }
 0x2da   :  { %v828_v19 = vpop.permute.xlu0 %827  ;;  %v729_v9 = vpop.permute.xlu1 %728 }
 0x2db   :  { %v867_v45 = vadd.f32 %v828_v19, %v1882_v44  ;;  %v782_v46 = vmul.f32 %v729_v9, %v2219_v16 }
 0x2dd   :  { %v1017_v7 = vpop.permute.xlu2 %1016  ;;  %817 = vrot.lane.b32.xlu2 %v782_v46, %s1440_s29  ;;  %v963_v32 = vadd.f32 %v1975_v55, %v867_v45 }
 0x2de   :  { %v1046_v48 = vmul.f32 %v1017_v7, %v605_v28 }
 0x2e0   :  { %1089 = vrot.lane.b32.xlu1 %v1046_v48, %s1440_s29 }
 0x2e2   :  { %v1092_v15 = vpop.permute.xlu0 %1091 }
 0x2e3   :  { %v889_v6 = vpop.permute.xlu1 %888 }
 0x2e4   :  { %v2314_v22 = vmul.f32 %v889_v6, %v581_v25 }
 0x2e5   :  { %1081 = vrot.lane.b32.xlu2 %v1042_v33, %s1440_s29 }
 0x2e6   :  { %v2317_v44 = vpop.permute.xlu2 %1176 }
 0x2e8   :  { %1192 = vperm.xlu1 %1370, %v2043_v5   ;;  %v573_v5 = vld [vmem:[%s2491_s2 + $0x10] sm:$0xff] }
 0x2ea   :  { %v822_v16 = vpop.permute.xlu0 %821 }
 0x2eb   :  { %v864_v35 = vadd.f32 %v822_v16, %v2056_v31  ;;  %v1195_v31 = vmul.f32 %v1898_v60, %v573_v5  ;;  %v609_v60 = vld [vmem:[%s2491_s2 + $0x130] sm:$0xff] }
 0x2ec   :  { %v761_v55 = vpop.permute.xlu1 %760 }
 0x2ed   :  { %v790_v23 = vmul.f32 %v761_v55, %v2249_v52  ;;  %841 = vrot.lane.b32.xlu2 %v794_v38, %s1440_s29  ;;  %v2324_v27 = vadd.f32 %v2095_v8, %v864_v35  ;;  %v597_v55 = vld [vmem:[%s2491_s2 + $0xd0] sm:$0xff] }
 0x2ee   :  { %v812_v3 = vpop.permute.xlu2 %811 }
 0x2ef   :  { %v859_v25 = vadd.f32 %v812_v3, %v1806_v58  ;;  %833 = vrot.lane.b32.xlu0 %v790_v23, %s1440_s29 }
 0x2f1   :  { %v955_v43 = vadd.f32 %v1873_v37, %v859_v25  ;;  %v1203_v25 = vmul.f32 %v1980_v11, %v597_v55 }
 0x2f3   :  { %v1115_v2 = vadd.f32 %v1068_v34, %v955_v43  ;;  %v1207_v34 = vmul.f32 %v2033_v61, %v609_v60 }
 0x2f5   :  { %v1211_v52 = vadd.f32 %v1195_v31, %v1115_v2  ;;  %1188 = vperm.xlu2 %1368, %v1885_v1   ;;  %v921_v19 = vpop.permute.xlu1 %920 }
 0x2f6   :  { %v1076_v8 = vpop.permute.xlu2 %1075  ;;  %v2334_v9 = vmul.f32 %v921_v19, %v605_v28  ;;  %v588_v19 = vld [vmem:[%s2491_s2 + $0x88] sm:$0xff] }
 0x2f7   :  { %1227 = vst.msk [vmem:[%s2492_s3] sm:$0xff] %vm38_vm0, %v1211_v52 }
 0x2fe   :  { %v836_v58 = vpop.permute.xlu2 %835  ;;  %v1033_v45 = vpop.permute.xlu1 %1032 }
 0x2ff   :  { %v871_v46 = vadd.f32 %v836_v58, %v1929_v12  ;;  %v1086_v37 = vpop.permute.xlu0 %1085  ;;  %v1050_v7 = vmul.f32 %v1033_v45, %v617_v24 }
 0x301   :  { %v967_v1 = vadd.f32 %v1926_v10, %v871_v46  ;;  %1097 = vrot.lane.b32.xlu0 %v1050_v7, %s1440_s29  ;;  %v585_v10 = vld [vmem:[%s2491_s2 + $0x70] sm:$0xff]  ;;  %v1200_v46 = vmul.f32 %v2039_v40, %v588_v19 }
 0x302   :  { %v1199_v38 = vmul.f32 %v1914_v0, %v585_v10  ;;  %v600_v0 = vld [vmem:[%s2491_s2 + $0xe8] sm:$0xff]  ;;  %v2508_v10 = vld [vmem:[#allocation5_spill] sm:$0xff] }
 0x303   :  { %v1127_v28 = vadd.f32 %v1092_v15, %v967_v1  ;;  %v1204_v5 = vmul.f32 %v2184_v18, %v600_v0  ;;  %v603_v0 = vld [vmem:[%s2491_s2 + $0x100] sm:$0xff] }
 0x305   :  { %v1223_v48 = vadd.f32 %v1207_v34, %v1127_v28 }
 0x306   :  { %v1070_v33 = vpop.permute.xlu2 %1069  ;;  %v820_v6 = vpop.permute.xlu1 %819 }
 0x307   :  { %1239 = vst.msk [vmem:[%s2492_s3 + $0x60] sm:$0xff] %vm38_vm0, %v1223_v48  ;;  %v816_v12 = vpop.permute.xlu0 %815  ;;  %v863_v24 = vadd.f32 %v820_v6, %v1821_v59 }
 0x308   :  { %v861_v16 = vadd.f32 %v816_v12, %v2205_v63 }
 0x309   :  { %v959_v61 = vadd.f32 %v1856_v21, %v863_v24  ;;  %1184 = vperm.xlu0 %1369, %v1785_v39  }
 0x30a   :  { %v957_v15 = vadd.f32 %v2157_v47, %v861_v16 }
 0x30b   :  { %v1119_v35 = vadd.f32 %v1076_v8, %v959_v61 }
 0x30d   :  { %v1215_v59 = vadd.f32 %v1199_v38, %v1119_v35 }
 0x30e   :  { %v830_v23 = vpop.permute.xlu2 %829  ;;  %v1084_v3 = vpop.permute.xlu1 %1083 }
 0x30f   :  { %1231 = vst.msk [vmem:[%s2492_s3 + $0x20] sm:$0xff] %vm38_vm0, %v1215_v59  ;;  %v868_v39 = vadd.f32 %v830_v23, %v2070_v51  ;;  %v1123_v21 = vadd.f32 %v1084_v3, %v963_v32  ;;  %v2509_v59 = vld [vmem:[#allocation6_spill] sm:$0xff] }
 0x311   :  { %v964_v47 = vadd.f32 %v2067_v50, %v868_v39  ;;  %v1219_v63 = vadd.f32 %v1203_v25, %v1123_v21  ;;  %v576_v50 = vld [vmem:[%s2491_s2 + $0x28] sm:$0xff] }
 0x312   :  { %v1196_v32 = vmul.f32 %v2133_v17, %v576_v50  ;;  %v591_v17 = vld [vmem:[%s2491_s2 + $0xa0] sm:$0xff] }
 0x313   :  { %v1124_v43 = vadd.f32 %v1086_v37, %v964_v47  ;;  %1235 = vst.msk [vmem:[%s2492_s3 + $0x40] sm:$0xff] %vm38_vm0, %v1219_v63  ;;  %v2505_v37 = vld [vmem:[#allocation3_spill] sm:$0xff]  ;;  %v1201_v34 = vmul.f32 %v2234_v62, %v591_v17  ;;  %v579_v62 = vld [vmem:[%s2491_s2 + $0x40] sm:$0xff]  ;;  %v582_v63 = vld [vmem:[%s2491_s2 + $0x58] sm:$0xff] }
 0x314   :  { %v1197_v16 = vmul.f32 %v2508_v10, %v579_v62 }
 0x315   :  { %v1220_v11 = vadd.f32 %v1204_v5, %v1124_v43  ;;  %v1205_v43 = vmul.f32 %v2208_v29, %v603_v0 }
 0x316   :  { %v1094_v31 = vpop.permute.xlu2 %1093  ;;  %v814_v2 = vpop.permute.xlu1 %813 }
 0x317   :  { %1236 = vst.msk [vmem:[%s2492_s3 + $0x48] sm:$0xff] %vm38_vm0, %v1220_v11  ;;  %v860_v51 = vadd.f32 %v814_v2, %v1955_v42 }
 0x319   :  { %v956_v18 = vadd.f32 %v2020_v57, %v860_v51  ;;  %v1080_v1 = vpop.permute.xlu0 %1079 }
 0x31b   :  { %v1116_v52 = vadd.f32 %v1070_v33, %v956_v18  ;;  %v2507_v33 = vld [vmem:[#allocation2_spill] sm:$0xff] }
 0x31d   :  { %v1212_v8 = vadd.f32 %v1196_v32, %v1116_v52 }
 0x31e   :  { %v824_v58 = vpop.permute.xlu2 %823  ;;  %v1078_v45 = vpop.permute.xlu1 %1077 }
 0x31f   :  { %1228 = vst.msk [vmem:[%s2492_s3 + $0x8] sm:$0xff] %vm38_vm0, %v1212_v8  ;;  %v865_v42 = vadd.f32 %v824_v58, %v2131_v36  ;;  %v1120_v57 = vadd.f32 %v1078_v45, %v2324_v27  ;;  %v2506_v27 = vld [vmem:[#allocation4_spill] sm:$0xff]  ;;  %v615_v45 = vld [vmem:[%s2491_s2 + $0x160] sm:$0xff] }
 0x321   :  { %v961_v7 = vadd.f32 %v2505_v37, %v865_v42  ;;  %v1216_v60 = vadd.f32 %v1200_v46, %v1120_v57 }
 0x323   :  { %v1121_v40 = vadd.f32 %v1080_v1, %v961_v7  ;;  %1232 = vst.msk [vmem:[%s2492_s3 + $0x28] sm:$0xff] %vm38_vm0, %v1216_v60 }
 0x325   :  { %v1217_v28 = vadd.f32 %v1201_v34, %v1121_v40 }
 0x326   :  { %v838_v36 = vpop.permute.xlu1 %837  ;;  %v1088_v61 = vpop.permute.xlu2 %1087 }
 0x327   :  { %1233 = vst.msk [vmem:[%s2492_s3 + $0x30] sm:$0xff] %vm38_vm0, %v1217_v28  ;;  %v872_v48 = vadd.f32 %v838_v36, %v2506_v27 }
 0x329   :  { %v968_v6 = vadd.f32 %v2507_v33, %v872_v48 }
 0x32b   :  { %v2413_v12 = vadd.f32 %v1094_v31, %v968_v6 }
 0x32e   :  { %v1072_v24 = vpop.permute.xlu1 %1071 }
 0x32f   :  { %v1117_v38 = vadd.f32 %v1072_v24, %v957_v15 }
 0x331   :  { %v1213_v35 = vadd.f32 %v1197_v16, %v1117_v38 }
 0x333   :  { %1229 = vst.msk [vmem:[%s2492_s3 + $0x10] sm:$0xff] %vm38_vm0, %v1213_v35 }
 0x334   :  { %v840_v55 = vpop.permute.xlu0 %839 }
 0x335   :  { %v873_v23 = vadd.f32 %v840_v55, %v2509_v59 }
 0x336   :  { %v832_v3 = vpop.permute.xlu1 %831 }
 0x337   :  { %v869_v25 = vadd.f32 %v832_v3, %v2251_v41  ;;  %v818_v39 = vpop.permute.xlu2 %817  ;;  %v969_v21 = vadd.f32 %v2283_v54, %v873_v23  ;;  %v1198_v54 = vmul.f32 %v2290_v30, %v582_v63  ;;  %v594_v30 = vld [vmem:[%s2491_s2 + $0xb8] sm:$0xff] }
 0x338   :  { %v862_v15 = vadd.f32 %v818_v39, %v2225_v56  ;;  %v1202_v19 = vmul.f32 %v2236_v49, %v594_v30 }
 0x339   :  { %v965_v47 = vadd.f32 %v2196_v53, %v869_v25 }
 0x33a   :  { %v958_v5 = vadd.f32 %v2314_v22, %v862_v15 }
 0x33b   :  { %v1125_v41 = vadd.f32 %v1088_v61, %v965_v47 }
 0x33c   :  { %v1074_v11 = vpop.permute.xlu0 %1073 }
 0x33d   :  { %v1221_v31 = vadd.f32 %v1205_v43, %v1125_v41  ;;  %v1118_v2 = vadd.f32 %v1074_v11, %v958_v5 }
 0x33e   :  { %v1096_v51 = vpop.permute.xlu1 %1095 }
 0x33f   :  { %1237 = vst.msk [vmem:[%s2492_s3 + $0x50] sm:$0xff] %vm38_vm0, %v1221_v31  ;;  %v1214_v53 = vadd.f32 %v1198_v54, %v1118_v2  ;;  %v1082_v56 = vpop.permute.xlu2 %1081  ;;  %v1129_v46 = vadd.f32 %v1096_v51, %v969_v21 }
 0x341   :  { %1230 = vst.msk [vmem:[%s2492_s3 + $0x18] sm:$0xff] %vm38_vm0, %v1214_v53 }
 0x346   :  { %v826_v29 = vpop.permute.xlu1 %825 }
 0x347   :  { %v866_v22 = vadd.f32 %v826_v29, %v2297_v26  ;;  %v842_v50 = vpop.permute.xlu2 %841 }
 0x348   :  { %v874_v18 = vadd.f32 %v842_v50, %v2303_v14 }
 0x349   :  { %v962_v32 = vadd.f32 %v2259_v13, %v866_v22 }
 0x34a   :  { %v970_v52 = vadd.f32 %v2288_v4, %v874_v18  ;;  %v606_v4 = vld [vmem:[%s2491_s2 + $0x118] sm:$0xff] }
 0x34b   :  { %v1122_v8 = vadd.f32 %v1082_v56, %v962_v32  ;;  %v1206_v37 = vmul.f32 %v2317_v44, %v606_v4  ;;  %v612_v44 = vld [vmem:[%s2491_s2 + $0x148] sm:$0xff] }
 0x34d   :  { %v1218_v58 = vadd.f32 %v1202_v19, %v1122_v8 }
 0x34f   :  { %1234 = vst.msk [vmem:[%s2492_s3 + $0x38] sm:$0xff] %vm38_vm0, %v1218_v58  ;;  %v1189_v26 = vpop.permute.xlu2 %1188 }
 0x350   :  { %v1209_v14 = vmul.f32 %v1189_v26, %v615_v45 }
 0x352   :  { %v1225_v42 = vadd.f32 %v1209_v14, %v1129_v46  ;;  %v1090_v17 = vpop.permute.xlu1 %1089 }
 0x354   :  { %1241 = vst.msk [vmem:[%s2492_s3 + $0x70] sm:$0xff] %vm38_vm0, %v1225_v42 }
 0x35a   :  { %v1193_v1 = vpop.permute.xlu1 %1192 }
 0x361   :  { %v834_v49 = vpop.permute.xlu0 %833 }
 0x362   :  { %v870_v13 = vadd.f32 %v834_v49, %v2257_v20  ;;  %v618_v20 = vld [vmem:[%s2491_s2 + $0x178] sm:$0xff] }
 0x363   :  { %v1210_v40 = vmul.f32 %v1193_v1, %v618_v20 }
 0x364   :  { %v966_v57 = vadd.f32 %v2334_v9, %v870_v13 }
 0x366   :  { %v1126_v7 = vadd.f32 %v1090_v17, %v966_v57 }
 0x368   :  { %v1222_v60 = vadd.f32 %v1206_v37, %v1126_v7 }
 0x36a   :  { %1238 = vst.msk [vmem:[%s2492_s3 + $0x58] sm:$0xff] %vm38_vm0, %v1222_v60 }
 0x373   :  { %v1098_v34 = vpop.permute.xlu0 %1097 }
 0x374   :  { %v1130_v28 = vadd.f32 %v1098_v34, %v970_v52 }
 0x376   :  { %v1226_v36 = vadd.f32 %v1210_v40, %v1130_v28 }
 0x378   :  { %1242 = vst.msk [vmem:[%s2492_s3 + $0x78] sm:$0xff] %vm38_vm0, %v1226_v36 }
 0x37b   :  { %v1185_v9 = vpop.permute.xlu0 %1184 }
 0x37c   :  { %v1208_v27 = vmul.f32 %v1185_v9, %v612_v44 }
 0x37e   :  { %v1224_v48 = vadd.f32 %v1208_v27, %v2413_v12 }
 0x380   :  { %1240 = vst.msk [vmem:[%s2492_s3 + $0x68] sm:$0xff] %vm38_vm0, %v1224_v48 }

</bundles_post_ra>
